<compile_context>
chip_gen: v7x
topology: tpu7x:2x2x1
jax: 0.10.0
libtpu: 0.0.40
codegen_flags: <defaults>
</compile_context>

<pallas_src>
import jax
import jax.numpy as jnp
from jax import lax
from jax.experimental import pallas as pl
from jax.experimental.pallas import tpu as pltpu

EPS = 1e-5
KH = KW = 3
KT = KH * KW


def _round_up(x, m):
    return (x + m - 1) // m * m


def _make_kernel(m_true, tm):
    """Kernel factory closing over the true pixel count (for BN stats) and tile size."""
    inv_m = 1.0 / float(m_true)

    def kernel(p_ref, w_ref, gamma_ref, beta_ref, o_ref, s1_ref, s2_ref):
        # p_ref:     (TM, Kp)   bf16 im2col tile (rows of pixels, fused tap x cin)
        # w_ref:     (Kp, Cp)   bf16 fused block-diagonal weight (resident)
        # gamma_ref: (1, Cp)    f32
        # beta_ref:  (1, Cp)    f32
        # o_ref:     (Mp, Cp)   f32 resident output (constant block index)
        # s1/s2:     (1, Cp)    f32 running sum / sum-of-squares
        i = pl.program_id(0)

        @pl.when(i == 0)
        def _init():
            s1_ref[...] = jnp.zeros_like(s1_ref)
            s2_ref[...] = jnp.zeros_like(s2_ref)

        # One long-K bf16 matmul on the MXU, f32 accumulation.
        acc = jnp.dot(p_ref[...], w_ref[...],
                      preferred_element_type=jnp.float32)      # (TM, Cp)

        # Single-pass BN stats (padded rows / padded channels are all-zero).
        s1_ref[...] += jnp.sum(acc, axis=0, keepdims=True)
        s2_ref[...] += jnp.sum(acc * acc, axis=0, keepdims=True)

        row0 = pl.multiple_of(i * tm, tm)
        o_ref[pl.ds(row0, tm), :] = acc

        @pl.when(i == pl.num_programs(0) - 1)
        def _finalize():
            mean = s1_ref[...] * inv_m
            var = s2_ref[...] * inv_m - mean * mean             # biased batch var
            scale = gamma_ref[...] * lax.rsqrt(var + EPS)
            shift = beta_ref[...] - mean * scale
            o_ref[...] = o_ref[...] * scale + shift             # in-place, lane-dense

    return kernel


def grouped_conv_bn(x_nchw, weight_oihw, gamma, beta, groups, *, tm=128):
    """x_nchw: (N, C, H, W); weight_oihw: (C, C//groups, 3, 3); gamma/beta: (C,)."""
    N, C, H, W = x_nchw.shape
    G = groups
    Cg = C // G
    M = N * H * W

    Cp = _round_up(C, 128)          # lane-dense output channels
    K = KT * C
    Kp = _round_up(K, 128)          # fused (tap, cin) contraction dim
    TM = min(tm, _round_up(M, 8))   # M tile (multiple of 8 sublanes)
    Mp = _round_up(M, TM)
    n_tiles = Mp // TM

    # --- im2col once (bf16), fused along K = (tap, cin) ---
    x = jnp.transpose(x_nchw, (0, 2, 3, 1)).astype(jnp.bfloat16)        # (N,H,W,C)
    xp = jnp.pad(x, ((0, 0), (1, 1), (1, 1), (0, 0)))                   # (N,H+2,W+2,C)
    taps = [xp[:, kh:kh + H, kw:kw + W, :].reshape(M, C)
            for kh in range(KH) for kw in range(KW)]
    patches = jnp.concatenate(taps, axis=1)                             # (M, K)
    patches = jnp.pad(patches, ((0, Mp - M), (0, Kp - K)))              # (Mp, Kp) bf16

    # --- fused block-diagonal weight: rows = (tap, cin), cols = cout ---
    w = weight_oihw.reshape(G, Cg, Cg, KH, KW)                  # [g, out_j, in_i, kh, kw]
    w = jnp.transpose(w, (3, 4, 0, 2, 1)).reshape(KT, G, Cg, Cg)  # [t, g, in_i, out_j]
    eye_g = jnp.eye(G, dtype=w.dtype)
    wbd = jnp.einsum('tgij,gh->tgihj', w, eye_g).reshape(K, C)
    wbd = jnp.pad(wbd, ((0, Kp - K), (0, Cp - C))).astype(jnp.bfloat16)  # (Kp, Cp)

    gamma_p = jnp.pad(gamma.astype(jnp.float32), (0, Cp - C)).reshape(1, Cp)
    beta_p = jnp.pad(beta.astype(jnp.float32), (0, Cp - C)).reshape(1, Cp)
    # padded channels: conv output 0, var 0 -> rsqrt(eps) finite, no NaN; sliced off.

    # VMEM budget guard: resident f32 output + resident bf16 weight + 2x bf16
    # patch tiles must fit (v7x only has 64 MiB physical VMEM, 32 MiB default).
    vmem_bytes = Mp * Cp * 4 + Kp * Cp * 2 + 2 * TM * Kp * 2 + 8 * Cp * 4
    assert vmem_bytes < 48 * 1024 * 1024, (
        "shape too large for the resident-output single-pass-BN design; "
        "tile M with a two-pass BN instead")

    out = pl.pallas_call(
        _make_kernel(M, TM),
        out_shape=jax.ShapeDtypeStruct((Mp, Cp), jnp.float32),
        grid_spec=pltpu.PrefetchScalarGridSpec(
            num_scalar_prefetch=0,
            grid=(n_tiles,),
            in_specs=[
                pl.BlockSpec((TM, Kp), lambda i: (i, 0)),    # streamed patch tiles
                pl.BlockSpec((Kp, Cp), lambda i: (0, 0)),    # resident weight
                pl.BlockSpec((1, Cp), lambda i: (0, 0)),
                pl.BlockSpec((1, Cp), lambda i: (0, 0)),
            ],
            out_specs=pl.BlockSpec((Mp, Cp), lambda i: (0, 0)),   # resident output
            scratch_shapes=[pltpu.VMEM((1, Cp), jnp.float32),
                            pltpu.VMEM((1, Cp), jnp.float32)],
        ),
        compiler_params=pltpu.CompilerParams(
            dimension_semantics=("arbitrary",)),
    )(patches, wbd, gamma_p, beta_p)

    # back to NCHW: slice off M/C padding, one reshape + one transpose
    return out[:M, :C].reshape(N, H, W, C).transpose(0, 3, 1, 2)


def _reference(x_nchw, weight_oihw, gamma, beta, groups):
    conv = lax.conv_general_dilated(
        x_nchw, weight_oihw,
        window_strides=(1, 1),
        padding=((1, 1), (1, 1)),
        dimension_numbers=("NCHW", "OIHW", "NCHW"),
        feature_group_count=groups,
    )
    mean = jnp.mean(conv, axis=(0, 2, 3), keepdims=True)
    var = jnp.mean((conv - mean) ** 2, axis=(0, 2, 3), keepdims=True)
    return (conv - mean) * lax.rsqrt(var + EPS) * gamma[None, :, None, None] \
        + beta[None, :, None, None]


if __name__ == "__main__":
    # Small shapes consistent with the module: groups=11, channels divisible
    # by 11, 14x14 spatial like the original input.
    N, C, H, W, G = 2, 88, 14, 14, 11
    Cg = C // G

    key = jax.random.PRNGKey(0)
    kx, kw, kg, kb = jax.random.split(key, 4)
    # Conv operands are pre-quantized to bf16-representable f32 so the bf16
    # MXU path and the f32 reference see identical inputs.
    x = jax.random.normal(kx, (N, C, H, W), dtype=jnp.float32)
    x = x.astype(jnp.bfloat16).astype(jnp.float32)
    weight = 0.05 * jax.random.normal(kw, (C, Cg, KH, KW), dtype=jnp.float32)
    weight = weight.astype(jnp.bfloat16).astype(jnp.float32)
    gamma = 1.0 + 0.1 * jax.random.normal(kg, (C,), dtype=jnp.float32)
    beta = 0.1 * jax.random.normal(kb, (C,), dtype=jnp.float32)

    out = grouped_conv_bn(x, weight, gamma, beta, G)
    out = jax.block_until_ready(out)

    ref = _reference(x, weight, gamma, beta, G)
    max_err = float(jnp.max(jnp.abs(out - ref)))
    assert out.shape == (N, C, H, W), out.shape
    assert max_err < 1e-2, f"max abs error {max_err}"

    print("KERNEL_OK")
</pallas_src>

<mosaic_0001>
module attributes {stable_mosaic.version = 11 : i64} {
  func.func @kernel(%arg0: i32, %arg1: memref<128x896xbf16, #tpu.memory_space<vmem>>, %arg2: memref<896x128xbf16, #tpu.memory_space<vmem>>, %arg3: memref<1x128xf32, #tpu.memory_space<vmem>>, %arg4: memref<1x128xf32, #tpu.memory_space<vmem>>, %arg5: memref<512x128xf32, #tpu.memory_space<vmem>>, %arg6: memref<1x128xf32, #tpu.memory_space<vmem>>, %arg7: memref<1x128xf32, #tpu.memory_space<vmem>>) attributes {dimension_semantics = [#tpu.dimension_semantics<arbitrary>], iteration_bounds = array<i64: 4>, scalar_prefetch = 0 : i64, scratch_operands = 2 : i64, tpu.core_type = #tpu.core_type<tc>, window_params = [{transform_indices = @transform_0, window_bounds = array<i64: 128, 896>}, {pipeline_mode = #tpu.pipeline_mode<synchronous>, transform_indices = @transform_1, window_bounds = array<i64: 896, 128>}, {pipeline_mode = #tpu.pipeline_mode<synchronous>, transform_indices = @transform_2, window_bounds = array<i64: 1, 128>}, {pipeline_mode = #tpu.pipeline_mode<synchronous>, transform_indices = @transform_3, window_bounds = array<i64: 1, 128>}, {pipeline_mode = #tpu.pipeline_mode<synchronous>, transform_indices = @transform_4, window_bounds = array<i64: 512, 128>}]} {
    %c0_i32 = arith.constant 0 : i32
    %0 = arith.cmpi eq, %arg0, %c0_i32 : i32
    %1 = arith.extui %0 : i1 to i32
    %c0_i32_0 = arith.constant 0 : i32
    %2 = arith.cmpi ne, %1, %c0_i32_0 : i32
    scf.if %2 {
      %cst_16 = arith.constant 0.000000e+00 : f32
      %24 = vector.broadcast %cst_16 : f32 to vector<1x128xf32>
      %c0_17 = arith.constant 0 : index
      %c0_18 = arith.constant 0 : index
      %25 = vector.load %arg6[%c0_17, %c0_18] : memref<1x128xf32, #tpu.memory_space<vmem>>, vector<1x128xf32>
      tpu.vector_store %arg6[%c0_17, %c0_18], %24 {strides = array<i32>} : memref<1x128xf32, #tpu.memory_space<vmem>>, vector<1x128xf32>,
      %cst_19 = arith.constant 0.000000e+00 : f32
      %26 = vector.broadcast %cst_19 : f32 to vector<1x128xf32>
      %c0_20 = arith.constant 0 : index
      %c0_21 = arith.constant 0 : index
      %27 = vector.load %arg7[%c0_20, %c0_21] : memref<1x128xf32, #tpu.memory_space<vmem>>, vector<1x128xf32>
      tpu.vector_store %arg7[%c0_20, %c0_21], %26 {strides = array<i32>} : memref<1x128xf32, #tpu.memory_space<vmem>>, vector<1x128xf32>,
    } else {
    }
    %c0 = arith.constant 0 : index
    %c0_1 = arith.constant 0 : index
    %3 = vector.load %arg1[%c0, %c0_1] : memref<128x896xbf16, #tpu.memory_space<vmem>>, vector<128x896xbf16>
    %c0_2 = arith.constant 0 : index
    %c0_3 = arith.constant 0 : index
    %4 = vector.load %arg2[%c0_2, %c0_3] : memref<896x128xbf16, #tpu.memory_space<vmem>>, vector<896x128xbf16>
    %cst = arith.constant dense<0.000000e+00> : vector<128x128xf32>
    %5 = tpu.matmul %3, %4, %cst {dimension_numbers = #tpu.dot_dimension_numbers<[1], [0], [0], [1], [0, 0, 1, 1], [], []>} : vector<128x896xbf16>, vector<896x128xbf16>, vector<128x128xf32> -> vector<128x128xf32>
    %c0_4 = arith.constant 0 : index
    %c0_5 = arith.constant 0 : index
    %6 = vector.load %arg6[%c0_4, %c0_5] : memref<1x128xf32, #tpu.memory_space<vmem>>, vector<1x128xf32>
    %cst_6 = arith.constant dense<0.000000e+00> : vector<128xf32>
    %7 = vector.multi_reduction <add>, %5, %cst_6 [0] : vector<128x128xf32> to vector<128xf32>
    %8 = vector.shape_cast %7 : vector<128xf32> to vector<1x128xf32>
    %9 = arith.addf %6, %8 : vector<1x128xf32>
    %c0_7 = arith.constant 0 : index
    %c0_8 = arith.constant 0 : index
    %10 = vector.load %arg6[%c0_7, %c0_8] : memref<1x128xf32, #tpu.memory_space<vmem>>, vector<1x128xf32>
    tpu.vector_store %arg6[%c0_7, %c0_8], %9 {strides = array<i32>} : memref<1x128xf32, #tpu.memory_space<vmem>>, vector<1x128xf32>,
    %c0_9 = arith.constant 0 : index
    %c0_10 = arith.constant 0 : index
    %11 = vector.load %arg7[%c0_9, %c0_10] : memref<1x128xf32, #tpu.memory_space<vmem>>, vector<1x128xf32>
    %12 = arith.mulf %5, %5 : vector<128x128xf32>
    %cst_11 = arith.constant dense<0.000000e+00> : vector<128xf32>
    %13 = vector.multi_reduction <add>, %12, %cst_11 [0] : vector<128x128xf32> to vector<128xf32>
    %14 = vector.shape_cast %13 : vector<128xf32> to vector<1x128xf32>
    %15 = arith.addf %11, %14 : vector<1x128xf32>
    %c0_12 = arith.constant 0 : index
    %c0_13 = arith.constant 0 : index
    %16 = vector.load %arg7[%c0_12, %c0_13] : memref<1x128xf32, #tpu.memory_space<vmem>>, vector<1x128xf32>
    tpu.vector_store %arg7[%c0_12, %c0_13], %15 {strides = array<i32>} : memref<1x128xf32, #tpu.memory_space<vmem>>, vector<1x128xf32>,
    %c128_i32 = arith.constant 128 : i32
    %17 = arith.muli %arg0, %c128_i32 : i32
    %18 = tpu.assume_multiple %17, 128 : i32
    %19 = arith.index_cast %18 : i32 to index
    %c0_14 = arith.constant 0 : index
    %20 = vector.load %arg5[%19, %c0_14] : memref<512x128xf32, #tpu.memory_space<vmem>>, vector<128x128xf32>
    tpu.vector_store %arg5[%19, %c0_14], %5 {strides = array<i32>} : memref<512x128xf32, #tpu.memory_space<vmem>>, vector<128x128xf32>,
    %c3_i32 = arith.constant 3 : i32
    %21 = arith.cmpi eq, %arg0, %c3_i32 : i32
    %22 = arith.extui %21 : i1 to i32
    %c0_i32_15 = arith.constant 0 : i32
    %23 = arith.cmpi ne, %22, %c0_i32_15 : i32
    scf.if %23 {
      %c0_16 = arith.constant 0 : index
      %c0_17 = arith.constant 0 : index
      %24 = vector.load %arg6[%c0_16, %c0_17] : memref<1x128xf32, #tpu.memory_space<vmem>>, vector<1x128xf32>
      %cst_18 = arith.constant 0.00255102036 : f32
      %25 = vector.broadcast %cst_18 : f32 to vector<1x128xf32>
      %26 = arith.mulf %24, %25 : vector<1x128xf32>
      %c0_19 = arith.constant 0 : index
      %c0_20 = arith.constant 0 : index
      %27 = vector.load %arg7[%c0_19, %c0_20] : memref<1x128xf32, #tpu.memory_space<vmem>>, vector<1x128xf32>
      %cst_21 = arith.constant 0.00255102036 : f32
      %28 = vector.broadcast %cst_21 : f32 to vector<1x128xf32>
      %29 = arith.mulf %27, %28 : vector<1x128xf32>
      %30 = arith.mulf %26, %26 : vector<1x128xf32>
      %31 = arith.subf %29, %30 : vector<1x128xf32>
      %c0_22 = arith.constant 0 : index
      %c0_23 = arith.constant 0 : index
      %32 = vector.load %arg3[%c0_22, %c0_23] : memref<1x128xf32, #tpu.memory_space<vmem>>, vector<1x128xf32>
      %cst_24 = arith.constant 9.99999974E-6 : f32
      %33 = vector.broadcast %cst_24 : f32 to vector<1x128xf32>
      %34 = arith.addf %31, %33 : vector<1x128xf32>
      %35 = math.rsqrt %34 : vector<1x128xf32>
      %36 = arith.mulf %32, %35 : vector<1x128xf32>
      %c0_25 = arith.constant 0 : index
      %c0_26 = arith.constant 0 : index
      %37 = vector.load %arg4[%c0_25, %c0_26] : memref<1x128xf32, #tpu.memory_space<vmem>>, vector<1x128xf32>
      %38 = arith.mulf %26, %36 : vector<1x128xf32>
      %39 = arith.subf %37, %38 : vector<1x128xf32>
      %c0_27 = arith.constant 0 : index
      %c0_28 = arith.constant 0 : index
      %40 = vector.load %arg5[%c0_27, %c0_28] : memref<512x128xf32, #tpu.memory_space<vmem>>, vector<512x128xf32>
      %41 = vector.broadcast %36 : vector<1x128xf32> to vector<512x128xf32>
      %42 = arith.mulf %40, %41 : vector<512x128xf32>
      %43 = vector.broadcast %39 : vector<1x128xf32> to vector<512x128xf32>
      %44 = arith.addf %42, %43 : vector<512x128xf32>
      %c0_29 = arith.constant 0 : index
      %c0_30 = arith.constant 0 : index
      %45 = vector.load %arg5[%c0_29, %c0_30] : memref<512x128xf32, #tpu.memory_space<vmem>>, vector<512x128xf32>
      tpu.vector_store %arg5[%c0_29, %c0_30], %44 {strides = array<i32>} : memref<512x128xf32, #tpu.memory_space<vmem>>, vector<512x128xf32>,
    } else {
    }
    return
  }
  func.func @transform_0(%arg0: i32) -> (i32, i32) {
    %c0_i32 = arith.constant 0 : i32
    %c0_i32_0 = arith.constant 0 : i32
    return %arg0, %c0_i32 : i32, i32
  }
  func.func @transform_1(%arg0: i32) -> (i32, i32) {
    %c0_i32 = arith.constant 0 : i32
    %c0_i32_0 = arith.constant 0 : i32
    %c0_i32_1 = arith.constant 0 : i32
    return %c0_i32, %c0_i32_0 : i32, i32
  }
  func.func @transform_2(%arg0: i32) -> (i32, i32) {
    %c0_i32 = arith.constant 0 : i32
    %c0_i32_0 = arith.constant 0 : i32
    %c0_i32_1 = arith.constant 0 : i32
    return %c0_i32, %c0_i32_0 : i32, i32
  }
  func.func @transform_3(%arg0: i32) -> (i32, i32) {
    %c0_i32 = arith.constant 0 : i32
    %c0_i32_0 = arith.constant 0 : i32
    %c0_i32_1 = arith.constant 0 : i32
    return %c0_i32, %c0_i32_0 : i32, i32
  }
  func.func @transform_4(%arg0: i32) -> (i32, i32) {
    %c0_i32 = arith.constant 0 : i32
    %c0_i32_0 = arith.constant 0 : i32
    %c0_i32_1 = arith.constant 0 : i32
    return %c0_i32, %c0_i32_0 : i32, i32
  }
}

</mosaic_0001>

<bundles_post_ra>
// kernel: tpu_custom_call.1
= control target key start
LH: loop header
LB: loop body
LE: loop exit
PB: predicated region body
PF: predicated region fallthrough
CT: control target
= control target key end

     0   :  { %9 = vsyncpa [#allocation5], 0  ;;  %s3029_s0 = inlined_call_operand.hbm [shape: bf16[512,896], index: 0, kind: input, shape index: {}]   ;;  %s3030_s1 = inlined_call_operand.hbm [shape: bf16[896,128], index: 1, kind: input, shape index: {}]   ;;  %s3031_s2 = inlined_call_operand.vmem [shape: f32[1,128], index: 2, kind: input, shape index: {}]   ;;  %s3032_s3 = inlined_call_operand.vmem [shape: f32[1,128], index: 3, kind: input, shape index: {}]   ;;  %s3033_s4 = inlined_call_operand.hbm [shape: f32[512,128], index: 4, kind: output, shape index: {}]  }
   0x1   :  { %11 = vsyncpa [#allocation5 + $0x1], 0 }
   0x2   :  { %12 = vsyncpa [#allocation8], 0 }
   0x3   :  { %13 = vsyncpa [#allocation6], 0  ;;  %s2590_s15 = smov 0   ;;  %s2592_s16 = smov 0  }
   0x4   :  { %s2594_s17 = smov 0   ;;  %s2596_s18 = smov 0  }
   0x5 LB: > { %s2609_s19 = sadd.s32 4294967295, %s2553_s18   ;;  %p39_p0 = scmp.ne.s32.totalorder %s2545_s16, %s2541_s15  ;;  %s2553_s18 = sphi %s2596_s18, %s3049_s18   ;;  %s2549_s17 = sphi %s2594_s17, %s3048_s17   ;;  %s2545_s16 = sphi %s2592_s16, %s3047_s16   ;;  %s2541_s15 = sphi %s2590_s15, %s3046_s15  }
   0x6   : > { %p3034_p1 = scmp.eq.s32.totalorder %s2609_s19, 0  ;;  %p1855_p2 = scmp.ge.s32.totalorder %s2553_s18, 1 }
   0x7   : > { %p134_p3 = scmp.lt.s32.totalorder %s2553_s18, 5  ;;  %s2555_s22 = smov [#allocation7]  }
   0x8   : > { %p2618_p5 = por %p3034_p1, %p39_p0  ;;  %s146_s23 = sshll.u32 %s2555_s22, 4  ;;  %s147_s23 = int_to_ptr.vmem [resolvable:$true] %s146_s23 }
   0x9   : > { %p2622_p6 = pnand %p1855_p2, %p134_p3  ;;  %s2635_s25 = sadd.s32 1, %s2553_s18  }
   0xa   : > { %s3037_s20 = scalar_select %p2618_p5, 1, 0 }
   0xb   : > { %s3038_s21 = scalar_select %p2622_p6, 1, 0 }
   0xc   : > { %p2235_p7 = pneg %p2622_p6  ;;  %s26_s26 = sadd.s32 1, %s2549_s17 }
   0xd   : > { %s23_s27 = ssub.s32 %s2553_s18, %s2635_s25  ;;  %s2427_s30 = scalar_lea.hbm %s3030_s1, 7168 }
   0xe   : > { %p2630_p8 = pnand %p2235_p7, %p3034_p1  ;;  %p2428_p9 = scmp.ne.s32.totalorder %s3030_s1, %s2427_s30 }
   0xf   : > { %p2434_p13 = scmp.lt.u32.totalorder %s2427_s30, %s3030_s1 }
  0x10   : > { %p2429_p10 = pneg %p2630_p8 }
  0x12   : > { %p2430_p11 = pnand %p2429_p10, %p2428_p9 }
  0x14   : > { %p2431_p12 = pneg %p2430_p11 }
  0x16   : > { %p2436_p0 = pnand %p2434_p13, %p2431_p12 }
  0x18   : > { %2439 = shalt.err (!%p2436_p0)
}
  0x19   : > { %s2440_s9 = scalar_lea.vmem %s147_s23, 7168  ;;  %p2448_p4 = scmp.lt.s32.totalorder %s147_s23, %s147_s23 }
  0x1a   : > { %p2441_p2 = scmp.ne.s32.totalorder %s147_s23, %s2440_s9  ;;  %p2449_p1 = scmp.lt.s32.totalorder %s2440_s9, %s2440_s9 }
  0x1c   : > { %p2443_p3 = pnand %p2441_p2, %p2429_p10  ;;  %p2450_p5 = por %p2449_p1, %p2448_p4 }
  0x1e   : > { %p2444_p7 = pneg %p2443_p3 }
  0x20   : > { %p2451_p6 = pnand %p2450_p5, %p2444_p7 }
  0x22   : > { %2454 = shalt.err (!%p2451_p6)
}
  0x23   : > { %s2556_s10 = smov 64   ;;  %s2557_s11 = smov 4  }
  0x24   : > { %2238 = dma.hbm_to_vmem [thread:$0]  (!%p2630_p8), %s3030_s1, 7168, %s147_s23, [#allocation8], %s2556_s10, %s2556_s10, %s2557_s11  }
  0x25   : > { %p24_p9 = scmp.eq.s32.totalorder %s23_s27, 0  ;;  %p33_p10 = scmp.ne.s32.totalorder %s2549_s17, %s2545_s16 }
  0x26   : > { %p34_p1 = scmp.eq.s32.totalorder %s2553_s18, 0  ;;  %p2244_p4 = scmp.lt.s32.totalorder %s2553_s18, 4 }
  0x27   : > { %s2661_s14 = scalar_select %p24_p9, %s2549_s17, %s26_s26  }
  0x28   : > { %p35_p5 = por %p34_p1, %p33_p10  ;;  %s166_s15 = sand.u32 1, %s2549_s17  }
  0x29   : > { %s2222_s22 = smul.u32 448, %s166_s15  ;;  %s2460_s8 = scalar_lea.hbm %s3029_s0, 28672 }
  0x2a   : > { %s2223_s28 = smul.u32 7168, %s2553_s18  ;;  %p2665_p6 = pnand %p2244_p4, %p35_p5 }
  0x2b   : > { %s170_s26 = scalar_lea.vmem [#allocation4], %s2222_s22  ;;  %s2676_s18 = scalar_lea.sflag [#allocation5], %s166_s15 }
  0x2c   : > { %s2672_s23 = scalar_lea.hbm %s3029_s0, %s2223_s28  ;;  %s178_s27 = sshll.u32 %s170_s26, 4  ;;  %s2674_s27 = int_to_ptr.vmem [resolvable:$true] %s178_s27 }
  0x2d   : > { %s2455_s5 = scalar_lea.hbm %s2672_s23, 7168  ;;  %p2457_p11 = pneg %p2665_p6 }
  0x2e   : > { %p2456_p8 = scmp.ne.s32.totalorder %s2672_s23, %s2455_s5  ;;  %p2461_p0 = scmp.lt.u32.totalorder %s2672_s23, %s3029_s0 }
  0x2f   : > { %p2462_p2 = scmp.lt.u32.totalorder %s2460_s8, %s2455_s5  ;;  %p2464_p7 = scmp.lt.u32.totalorder %s2455_s5, %s2672_s23 }
  0x30   : > { %p2458_p12 = pnand %p2457_p11, %p2456_p8 }
  0x31   : > { %p2463_p3 = por %p2462_p2, %p2461_p0 }
  0x32   : > { %p2459_p13 = pneg %p2458_p12 }
  0x33   : > { %p2465_p9 = por %p2464_p7, %p2463_p3 }
  0x35   : > { %p2466_p10 = pnand %p2465_p9, %p2459_p13 }
  0x37   : > { %2469 = shalt.err (!%p2466_p10)
}
  0x38   : > { %s2470_s11 = scalar_lea.vmem %s2674_s27, 7168  ;;  %s2558_s12 = smov [#allocation4]  }
  0x39   : > { %p2471_p1 = scmp.ne.s32.totalorder %s2674_s27, %s2470_s11  ;;  %s2475_s13 = sshll.u32 %s2558_s12, 4  ;;  %s2476_s13 = int_to_ptr.vmem [resolvable:$false] %s2475_s13 }
  0x3a   : > { %s2477_s15 = scalar_lea.vmem %s2476_s13, 14336  ;;  %p2478_p8 = scmp.lt.s32.totalorder %s2674_s27, %s2476_s13 }
  0x3b   : > { %p2473_p4 = pnand %p2471_p1, %p2457_p11  ;;  %p2479_p12 = scmp.lt.s32.totalorder %s2477_s15, %s2470_s11 }
  0x3d   : > { %p2474_p5 = pneg %p2473_p4  ;;  %p2480_p0 = por %p2479_p12, %p2478_p8 }
  0x3f   : > { %p2481_p2 = pnand %p2480_p0, %p2474_p5 }
  0x41   : > { %2484 = shalt.err (!%p2481_p2)
}
  0x42   : > { %s2559_s22 = smov 448   ;;  %s2560_s28 = smov 28  }
  0x43   : > { %2242 = dma.hbm_to_vmem [thread:$0]  (!%p2665_p6), %s2672_s23, 7168, %s2674_s27, %s2676_s18, %s2559_s22, %s2559_s22, %s2560_s28  }
  0x44   : > { %p3041_p11 = scmp.ne.s32.totalorder %s3038_s21, 0 }
  0x45   : > { %s192_s30 = sand.u32 (!%p3041_p11), 1, %s2545_s16   ;;  %p3042_p13 = scmp.ne.s32.totalorder (!%p3041_p11), %s3037_s20, 0 }
  0x46   : > { %190 = sbr.rel (%p3041_p11) target bundleno = 581 (0x245), region = 36  ;;  %s193_s26 = scalar_lea.sflag (!%p3041_p11), [#allocation5], %s192_s30 }
  0x47   : > { %s2224_s24 = smul.u32 (!%p3041_p11), 448, %s192_s30 }
  0x49   : > { %s2707_s5 = scalar_lea.vmem (!%p3041_p11), [#allocation4], %s2224_s24 }
  0x4d   : > { %2528 = dma.done.wait (%p3042_p13), %s193_s26, 7168  }
  0x4e   : > { %2530 = vsyncadd (%p3042_p13), %s193_s26, 4294960128  ;;  %p3043_p3 = scmp.eq.s32.totalorder %s2609_s19, 0 }
  0x50   : > { %2532 = dma.done.wait (%p3043_p3), [#allocation8], 7168   ;;  %p3044_p6 = pmov %p3043_p3 }
  0x51   : > { %p3045_p7 = scmp.ne.s32.totalorder %s2609_s19, 0 }
  0x52   : > { %2534 = vsyncadd (%p3044_p6), [#allocation8], 4294960128  ;;  %v2561_v0 = vmov (!%p3045_p7), 0.0  }
  0x53   : > { %225 = sbr.rel (%p3045_p7) target bundleno = 90 (0x5a), region = 48  ;;  %226 = vst [vmem:[#allocation2] sm:$0x1] (!%p3045_p7), %v2561_v0  ;;  %227 = vst [vmem:[#allocation3] sm:$0x1] (!%p3045_p7), %v2561_v0 }
  0x5a PF: > { %v2289_v1 = vld [vmem:[#allocation7 + $0x40] sm:$0xff]   ;;  %v2293_v5 = vld [vmem:[#allocation7 + $0x48] sm:$0xff]   ;;  %v2297_v9 = vld [vmem:[#allocation7 + $0x50] sm:$0xff]   ;;  %s1976_s20 = sshll.u32 %s2609_s19, 7  ;;  %p1977_p9 = scmp.ne.s32.totalorder %s2609_s19, 3 }
  0x5b   : > { %v2290_v2 = vld [vmem:[#allocation7 + $0xc0] sm:$0xff]   ;;  %1982 = vmatprep.subr.bf16.mxu0 %v2289_v1  ;;  %v2294_v6 = vld [vmem:[#allocation7 + $0xc8] sm:$0xff]   ;;  %v2298_v10 = vld [vmem:[#allocation7 + $0xd0] sm:$0xff]   ;;  %s2810_s21 = scalar_lea.vmem [#allocation9], %s1976_s20 }
  0x5c   : > { %v2291_v3 = vld [vmem:[#allocation7] sm:$0xff]   ;;  %2046 = vmatprep.subr.bf16.mxu1 %v2290_v2  ;;  %v2295_v7 = vld [vmem:[#allocation7 + $0x8] sm:$0xff]   ;;  %v2299_v11 = vld [vmem:[#allocation7 + $0x10] sm:$0xff]  }
  0x5d   : > { %v2292_v4 = vld [vmem:[#allocation7 + $0x80] sm:$0xff]   ;;  %1983 = vmatpush3.bf16.msra.mxu0 %v2291_v3  ;;  %v2296_v8 = vld [vmem:[#allocation7 + $0x88] sm:$0xff]   ;;  %v2300_v12 = vld [vmem:[#allocation7 + $0x90] sm:$0xff]  }
  0x5e   : > { %2047 = vmatpush3.bf16.msra.mxu1 %v2292_v4  ;;  %1984 = vmatprep.subr.bf16.mxu0 %v2293_v5  ;;  %v2301_v13 = vld [vmem:[#allocation7 + $0x58] sm:$0xff]   ;;  %v2305_v17 = vld [vmem:[#allocation7 + $0x60] sm:$0xff]   ;;  %v2309_v21 = vld [vmem:[#allocation7 + $0x68] sm:$0xff]  }
  0x5f   : > { %2048 = vmatprep.subr.bf16.mxu1 %v2294_v6  ;;  %v2302_v14 = vld [vmem:[#allocation7 + $0xd8] sm:$0xff]   ;;  %v2306_v18 = vld [vmem:[#allocation7 + $0xe0] sm:$0xff]   ;;  %v2310_v22 = vld [vmem:[#allocation7 + $0xe8] sm:$0xff]  }
  0x60   : > { %v2303_v15 = vld [vmem:[#allocation7 + $0x18] sm:$0xff]   ;;  %v2307_v19 = vld [vmem:[#allocation7 + $0x20] sm:$0xff]   ;;  %v2311_v23 = vld [vmem:[#allocation7 + $0x28] sm:$0xff]  }
  0x61   : > { %1985 = vmatpush3.bf16.msra.mxu0 %v2295_v7  ;;  %v2304_v16 = vld [vmem:[#allocation7 + $0x98] sm:$0xff]   ;;  %v2308_v20 = vld [vmem:[#allocation7 + $0xa0] sm:$0xff]   ;;  %v2312_v24 = vld [vmem:[#allocation7 + $0xa8] sm:$0xff]  }
  0x62   : > { %2049 = vmatpush3.bf16.msra.mxu1 %v2296_v8  ;;  %1986 = vmatprep.subr.bf16.mxu0 %v2297_v9  ;;  %v2313_v25 = vld [vmem:[#allocation7 + $0x70] sm:$0xff]   ;;  %v2317_v29 = vld [vmem:[#allocation7 + $0x78] sm:$0xff]   ;;  %v2323_v34 = vld [vmem:[%s2707_s5 + $0x4] ss:$28 sps:$4 sm:$0xff]  }
  0x63   : > { %2050 = vmatprep.subr.bf16.mxu1 %v2298_v10  ;;  %v2314_v26 = vld [vmem:[#allocation7 + $0xf0] sm:$0xff]   ;;  %v2318_v30 = vld [vmem:[#allocation7 + $0xf8] sm:$0xff]   ;;  %v2324_v35 = vld [vmem:[%s2707_s5 + $0x8] ss:$28 sps:$4 sm:$0xff]   ;;  %1060 = vmatprep.mubr.bf16.mxu0 %v2323_v34 }
  0x64   : > { %v2315_v27 = vld [vmem:[#allocation7 + $0x30] sm:$0xff]   ;;  %v2319_v31 = vld [vmem:[#allocation7 + $0x38] sm:$0xff]   ;;  %v2326_v36 = vld [vmem:[%s2707_s5 + $0xc] ss:$28 sps:$4 sm:$0xff]  }
  0x65   : > { %1987 = vmatpush3.bf16.msra.mxu0 %v2299_v11  ;;  %v2316_v28 = vld [vmem:[#allocation7 + $0xb0] sm:$0xff]   ;;  %v2320_v32 = vld [vmem:[#allocation7 + $0xb8] sm:$0xff]   ;;  %v2327_v37 = vld [vmem:[#allocation7 + $0x140] sm:$0xff]   ;;  %1157 = vmatprep.mubr.bf16.mxu1 %v2326_v36 }
  0x66   : > { %2051 = vmatpush3.bf16.msra.mxu1 %v2300_v12  ;;  %1988 = vmatprep.subr.bf16.mxu0 %v2301_v13  ;;  %v2321_v33 = vld [vmem:[%s2707_s5] ss:$28 sps:$4 sm:$0xff]   ;;  %v2333_v41 = vld [vmem:[%s2707_s5 + $0x38] ss:$28 sps:$4 sm:$0xff]   ;;  %v2335_v43 = vld [vmem:[#allocation7 + $0x148] sm:$0xff]  }
  0x67   : > { %2052 = vmatprep.subr.bf16.mxu1 %v2302_v14  ;;  %v2328_v38 = vld [vmem:[#allocation7 + $0x100] sm:$0xff]   ;;  %v2329_v39 = vld [vmem:[%s2707_s5 + $0x3c] ss:$28 sps:$4 sm:$0xff]   ;;  %v2336_v44 = vld [vmem:[#allocation7 + $0x108] sm:$0xff]  }
  0x68   : > { %v2331_v40 = vld [vmem:[%s2707_s5 + $0x44] ss:$28 sps:$4 sm:$0xff]   ;;  %v2337_v45 = vld [vmem:[%s2707_s5 + $0x74] ss:$28 sps:$4 sm:$0xff]   ;;  %v2339_v46 = vld [vmem:[%s2707_s5 + $0x7c] ss:$28 sps:$4 sm:$0xff]  }
  0x69   : > { %1989 = vmatpush3.bf16.msra.mxu0 %v2303_v15  ;;  %v2334_v42 = vld [vmem:[%s2707_s5 + $0x40] ss:$28 sps:$4 sm:$0xff]   ;;  %v2343_v47 = vld [vmem:[#allocation7 + $0x150] sm:$0xff]   ;;  %v2345_v51 = vld [vmem:[%s2707_s5 + $0xac] ss:$28 sps:$4 sm:$0xff]  }
  0x6a   : > { %2053 = vmatpush3.bf16.msra.mxu1 %v2304_v16  ;;  %1990 = vmatprep.subr.bf16.mxu0 %v2305_v17  ;;  %v2344_v48 = vld [vmem:[#allocation7 + $0x110] sm:$0xff]   ;;  %v2351_v53 = vld [vmem:[#allocation7 + $0x158] sm:$0xff]   ;;  %v2349_v55 = vld [vmem:[%s2707_s5 + $0xa8] ss:$28 sps:$4 sm:$0xff]  }
  0x6b   : > { %2054 = vmatprep.subr.bf16.mxu1 %v2306_v18  ;;  %v2341_v49 = vld [vmem:[%s2707_s5 + $0x70] ss:$28 sps:$4 sm:$0xff]   ;;  %v2342_v50 = vld [vmem:[%s2707_s5 + $0x78] ss:$28 sps:$4 sm:$0xff]   ;;  %v2359_v56 = vld [vmem:[#allocation7 + $0x160] sm:$0xff]  }
  0x6c   : > { %v2347_v52 = vld [vmem:[%s2707_s5 + $0xb4] ss:$28 sps:$4 sm:$0xff]   ;;  %v2352_v54 = vld [vmem:[#allocation7 + $0x118] sm:$0xff]   ;;  %v2360_v58 = vld [vmem:[#allocation7 + $0x180] sm:$0xff]  }
  0x6d   : > { %1991 = vmatpush3.bf16.msra.mxu0 %v2307_v19  ;;  %v2350_v57 = vld [vmem:[%s2707_s5 + $0xb0] ss:$28 sps:$4 sm:$0xff]   ;;  %v2361_v59 = vld [vmem:[#allocation7 + $0x120] sm:$0xff]   ;;  %v2362_v4 = vld [vmem:[%s2707_s5 + $0x11c] ss:$28 sps:$4 sm:$0xff]  }
  0x6e   : > { %2055 = vmatpush3.bf16.msra.mxu1 %v2308_v20  ;;  %1992 = vmatprep.subr.bf16.mxu0 %v2309_v21  ;;  %v2353_v60 = vld [vmem:[%s2707_s5 + $0xe4] ss:$28 sps:$4 sm:$0xff]   ;;  %v2355_v61 = vld [vmem:[%s2707_s5 + $0xec] ss:$28 sps:$4 sm:$0xff]   ;;  %v2371_v1 = vld [vmem:[#allocation7 + $0x190] sm:$0xff]  }
  0x6f   : > { %2056 = vmatprep.subr.bf16.mxu1 %v2310_v22  ;;  %v2368_v62 = vld [vmem:[#allocation7 + $0x168] sm:$0xff]   ;;  %v2357_v2 = vld [vmem:[%s2707_s5 + $0xe0] ss:$28 sps:$4 sm:$0xff]   ;;  %v2378_v6 = vld [vmem:[#allocation7 + $0x170] sm:$0xff]  }
  0x70   : > { %v2369_v63 = vld [vmem:[#allocation7 + $0x188] sm:$0xff]   ;;  %v2364_v5 = vld [vmem:[%s2707_s5 + $0x124] ss:$28 sps:$4 sm:$0xff]   ;;  %v2379_v7 = vld [vmem:[#allocation7 + $0x198] sm:$0xff]  }
  0x71   : > { %1993 = vmatpush3.bf16.msra.mxu0 %v2311_v23  ;;  %v2370_v0 = vld [vmem:[#allocation7 + $0x128] sm:$0xff]   ;;  %v2380_v8 = vld [vmem:[#allocation7 + $0x130] sm:$0xff]   ;;  %v2381_v9 = vld [vmem:[#allocation7 + $0x1a0] sm:$0xff]  }
  0x72   : > { %2057 = vmatpush3.bf16.msra.mxu1 %v2312_v24  ;;  %1994 = vmatprep.subr.bf16.mxu0 %v2313_v25  ;;  %v2358_v3 = vld [vmem:[%s2707_s5 + $0xe8] ss:$28 sps:$4 sm:$0xff]   ;;  %v2366_v10 = vld [vmem:[%s2707_s5 + $0x118] ss:$28 sps:$4 sm:$0xff]   ;;  %v2367_v11 = vld [vmem:[%s2707_s5 + $0x120] ss:$28 sps:$4 sm:$0xff]  }
  0x73   : > { %2058 = vmatprep.subr.bf16.mxu1 %v2314_v26  ;;  %v2372_v12 = vld [vmem:[%s2707_s5 + $0x154] ss:$28 sps:$4 sm:$0xff]   ;;  %v2374_v13 = vld [vmem:[%s2707_s5 + $0x15c] ss:$28 sps:$4 sm:$0xff]   ;;  %v2389_v15 = vld [vmem:[#allocation7 + $0x1a8] sm:$0xff]  }
  0x74   : > { %v2388_v14 = vld [vmem:[#allocation7 + $0x178] sm:$0xff]   ;;  %v2391_v17 = vld [vmem:[#allocation7 + $0x1b0] sm:$0xff]   ;;  %v2382_v20 = vld [vmem:[%s2707_s5 + $0x18c] ss:$28 sps:$4 sm:$0xff]  }
  0x75   : > { %1995 = vmatpush3.bf16.msra.mxu0 %v2315_v27  ;;  %v2390_v16 = vld [vmem:[#allocation7 + $0x138] sm:$0xff]   ;;  %v2376_v18 = vld [vmem:[%s2707_s5 + $0x150] ss:$28 sps:$4 sm:$0xff]   ;;  %v2386_v23 = vld [vmem:[%s2707_s5 + $0x188] ss:$28 sps:$4 sm:$0xff]  }
  0x76   : > { %2059 = vmatpush3.bf16.msra.mxu1 %v2316_v28  ;;  %1996 = vmatprep.subr.bf16.mxu0 %v2317_v29  ;;  %v2377_v19 = vld [vmem:[%s2707_s5 + $0x158] ss:$28 sps:$4 sm:$0xff]   ;;  %v2387_v24 = vld [vmem:[%s2707_s5 + $0x190] ss:$28 sps:$4 sm:$0xff]  }
  0x77   : > { %2060 = vmatprep.subr.bf16.mxu1 %v2318_v30  ;;  %v2384_v21 = vld [vmem:[%s2707_s5 + $0x194] ss:$28 sps:$4 sm:$0xff]   ;;  %v2395_v22 = vld [vmem:[#allocation7 + $0x1b8] sm:$0xff]   ;;  %v2398_v29 = vld [vmem:[%s2707_s5 + $0x4c] ss:$28 sps:$4 sm:$0xff]  }
  0x78   : > { %v2394_v25 = vld [vmem:[%s2707_s5 + $0x14] ss:$28 sps:$4 sm:$0xff]   ;;  %v2404_v30 = vld [vmem:[%s2707_s5 + $0x88] ss:$28 sps:$4 sm:$0xff]   ;;  %v2406_v36 = vld [vmem:[%s2707_s5 + $0xbc] ss:$28 sps:$4 sm:$0xff]  }
  0x79   : > { %1997 = vmatpush3.bf16.msra.mxu0 %v2319_v31  ;;  %v2396_v26 = vld [vmem:[%s2707_s5 + $0x18] ss:$28 sps:$4 sm:$0xff]   ;;  %v2392_v27 = vld [vmem:[%s2707_s5 + $0x10] ss:$28 sps:$4 sm:$0xff]   ;;  %v2400_v31 = vld [vmem:[%s2707_s5 + $0x48] ss:$28 sps:$4 sm:$0xff]  }
  0x7a   : > { %2061 = vmatpush3.bf16.msra.mxu1 %v2320_v32  ;;  %2110 = vmatprep.subr.bf16.mxu0 %v2327_v37  ;;  %v2397_v28 = vld [vmem:[%s2707_s5 + $0x50] ss:$28 sps:$4 sm:$0xff]   ;;  %v2401_v32 = vld [vmem:[%s2707_s5 + $0x84] ss:$28 sps:$4 sm:$0xff]   ;;  %v2412_v34 = vld [vmem:[%s2707_s5 + $0xf8] ss:$28 sps:$4 sm:$0xff]  }
  0x7b   : > { %2190 = vmatprep.subr.bf16.mxu1 %v2360_v58  ;;  %v2413_v37 = vld [vmem:[%s2707_s5 + $0x130] ss:$28 sps:$4 sm:$0xff]  }
  0x7c   : > { %1061 = vmatmul.mubr.bf16.vlgmr.msra.gmra.mrb[0].mxu0 %v2321_v33  ;;  %v2405_v33 = vld [vmem:[%s2707_s5 + $0xc0] ss:$28 sps:$4 sm:$0xff]  }
  0x7d   : > { %1158 = vmatmul.mubr.bf16.vlgmr.msra.gmra.mrb[0].mxu1 %v2324_v35  ;;  %2111 = vmatpush3.bf16.msra.mxu0 %v2328_v38  ;;  %v2403_v35 = vld [vmem:[%s2707_s5 + $0x80] ss:$28 sps:$4 sm:$0xff]   ;;  %v2420_v38 = vld [vmem:[%s2707_s5 + $0x168] ss:$28 sps:$4 sm:$0xff]  }
  0x7e   : > { %1068 = vmatprep.mubr.bf16.mxu0 %v2329_v39  ;;  %1165 = vmatprep.mubr.bf16.mxu1 %v2331_v40  ;;  %v2408_v39 = vld [vmem:[%s2707_s5 + $0xb8] ss:$28 sps:$4 sm:$0xff]  }
  0x7f   : > { %2112 = vmatprep.subr.bf16.mxu0 %v2335_v43  ;;  %2191 = vmatpush3.bf16.msra.mxu1 %v2360_v58  ;;  %v2409_v40 = vld [vmem:[%s2707_s5 + $0xf4] ss:$28 sps:$4 sm:$0xff]   ;;  %v2414_v43 = vld [vmem:[%s2707_s5 + $0x12c] ss:$28 sps:$4 sm:$0xff]  }
  0x80   : > { %2192 = vmatprep.subr.bf16.mxu1 %v2369_v63 }
  0x81   : > { %2113 = vmatpush3.bf16.msra.mxu0 %v2336_v44  ;;  %v2416_v44 = vld [vmem:[%s2707_s5 + $0x128] ss:$28 sps:$4 sm:$0xff]  }
  0x82   : > { %2114 = vmatprep.subr.bf16.mxu0 %v2343_v47  ;;  %v2422_v47 = vld [vmem:[%s2707_s5 + $0x19c] ss:$28 sps:$4 sm:$0xff]  }
  0x83   : > { %2193 = vmatpush3.bf16.msra.mxu1 %v2369_v63 }
  0x84   : > { %1069 = vmatmul.mubr.bf16.gmra.mrb[4].mxu0 %v2333_v41  ;;  %2194 = vmatprep.subr.bf16.mxu1 %v2371_v1  ;;  %v2421_v41 = vld [vmem:[%s2707_s5 + $0x1a0] ss:$28 sps:$4 sm:$0xff]  }
  0x85   : > { %1166 = vmatmul.mubr.bf16.gmra.mrb[4].mxu1 %v2334_v42  ;;  %1076 = vmatprep.mubr.bf16.mxu0 %v2337_v45  ;;  %v2411_v42 = vld [vmem:[%s2707_s5 + $0xf0] ss:$28 sps:$4 sm:$0xff]   ;;  %v2417_v45 = vld [vmem:[%s2707_s5 + $0x164] ss:$28 sps:$4 sm:$0xff]  }
  0x86   : > { %1173 = vmatprep.mubr.bf16.mxu1 %v2339_v46  ;;  %2115 = vmatpush3.bf16.msra.mxu0 %v2344_v48  ;;  %v2419_v46 = vld [vmem:[%s2707_s5 + $0x160] ss:$28 sps:$4 sm:$0xff]   ;;  %v2424_v48 = vld [vmem:[%s2707_s5 + $0x198] ss:$28 sps:$4 sm:$0xff]  }
  0x87   : > { %2116 = vmatprep.subr.bf16.mxu0 %v2351_v53  ;;  %2195 = vmatpush3.bf16.msra.mxu1 %v2371_v1 }
  0x88   : > { %2196 = vmatprep.subr.bf16.mxu1 %v2379_v7 }
  0x8a   : > { %2117 = vmatpush3.bf16.msra.mxu0 %v2352_v54 }
  0x8b   : > { %2118 = vmatprep.subr.bf16.mxu0 %v2359_v56  ;;  %2197 = vmatpush3.bf16.msra.mxu1 %v2379_v7 }
  0x8c   : > { %1077 = vmatmul.mubr.bf16.gmra.mrb[8].mxu0 %v2341_v49  ;;  %2198 = vmatprep.subr.bf16.mxu1 %v2381_v9 }
  0x8d   : > { %1174 = vmatmul.mubr.bf16.gmra.mrb[8].mxu1 %v2342_v50  ;;  %1084 = vmatprep.mubr.bf16.mxu0 %v2345_v51 }
  0x8e   : > { %1181 = vmatprep.mubr.bf16.mxu1 %v2347_v52  ;;  %2119 = vmatpush3.bf16.msra.mxu0 %v2361_v59 }
  0x8f   : > { %2120 = vmatprep.subr.bf16.mxu0 %v2368_v62  ;;  %2199 = vmatpush3.bf16.msra.mxu1 %v2381_v9 }
  0x90   : > { %2200 = vmatprep.subr.bf16.mxu1 %v2389_v15 }
  0x92   : > { %2121 = vmatpush3.bf16.msra.mxu0 %v2370_v0 }
  0x93   : > { %2122 = vmatprep.subr.bf16.mxu0 %v2378_v6  ;;  %2201 = vmatpush3.bf16.msra.mxu1 %v2389_v15 }
  0x94   : > { %1085 = vmatmul.mubr.bf16.gmra.mrb[12].mxu0 %v2349_v55  ;;  %2202 = vmatprep.subr.bf16.mxu1 %v2391_v17 }
  0x95   : > { %1182 = vmatmul.mubr.bf16.gmra.mrb[12].mxu1 %v2350_v57  ;;  %1092 = vmatprep.mubr.bf16.mxu0 %v2353_v60 }
  0x96   : > { %1189 = vmatprep.mubr.bf16.mxu1 %v2355_v61  ;;  %2123 = vmatpush3.bf16.msra.mxu0 %v2380_v8 }
  0x97   : > { %2124 = vmatprep.subr.bf16.mxu0 %v2388_v14  ;;  %2203 = vmatpush3.bf16.msra.mxu1 %v2391_v17 }
  0x98   : > { %2204 = vmatprep.subr.bf16.mxu1 %v2395_v22 }
  0x9a   : > { %2125 = vmatpush3.bf16.msra.mxu0 %v2390_v16 }
  0x9b   : > { %2205 = vmatpush3.bf16.msra.mxu1 %v2395_v22 }
  0x9c   : > { %1093 = vmatmul.mubr.bf16.gmra.mrb[16].mxu0 %v2357_v2 }
  0x9d   : > { %1190 = vmatmul.mubr.bf16.gmra.mrb[16].mxu1 %v2358_v3  ;;  %1100 = vmatprep.mubr.bf16.mxu0 %v2362_v4 }
  0x9e   : > { %1197 = vmatprep.mubr.bf16.mxu1 %v2364_v5 }
  0xa4   : > { %1101 = vmatmul.mubr.bf16.gmra.mrb[20].mxu0 %v2366_v10 }
  0xa5   : > { %1198 = vmatmul.mubr.bf16.gmra.mrb[20].mxu1 %v2367_v11  ;;  %1108 = vmatprep.mubr.bf16.mxu0 %v2372_v12 }
  0xa6   : > { %1205 = vmatprep.mubr.bf16.mxu1 %v2374_v13 }
  0xac   : > { %1109 = vmatmul.mubr.bf16.gmra.mrb[24].mxu0 %v2376_v18 }
  0xad   : > { %1206 = vmatmul.mubr.bf16.gmra.mrb[24].mxu1 %v2377_v19  ;;  %1116 = vmatprep.mubr.bf16.mxu0 %v2382_v20 }
  0xae   : > { %1213 = vmatprep.mubr.bf16.mxu1 %v2384_v21 }
  0xb4   : > { %1117 = vmatmul.mubr.bf16.gmra.mrb[28].mxu0 %v2386_v23 }
  0xb5   : > { %1214 = vmatmul.mubr.bf16.gmra.mrb[28].mxu1 %v2387_v24  ;;  %1254 = vmatprep.mubr.bf16.mxu0 %v2394_v25 }
  0xb6   : > { %2206 = vmatprep.mubr.bf16.mxu1 %v2396_v26 }
  0xbc   : > { %1255 = vmatmul.mubr.bf16.vlgmr.msra.gmra.mrb[32].mxu0 %v2392_v27 }
  0xbd   : > { %2207 = vmatmul.mubr.bf16.vlgmr.msra.gmra.mrb[32].mxu1 %v2397_v28  ;;  %1262 = vmatprep.mubr.bf16.mxu0 %v2398_v29 }
  0xbe   : > { %2210 = vmatprep.mubr.bf16.mxu1 %v2404_v30 }
  0xc4   : > { %1263 = vmatmul.mubr.bf16.gmra.mrb[36].mxu0 %v2400_v31 }
  0xc5   : > { %1270 = vmatprep.mubr.bf16.mxu0 %v2401_v32  ;;  %2211 = vmatmul.mubr.bf16.gmra.mrb[36].mxu1 %v2405_v33 }
  0xc6   : > { %2214 = vmatprep.mubr.bf16.mxu1 %v2412_v34 }
  0xcc   : > { %1271 = vmatmul.mubr.bf16.gmra.mrb[40].mxu0 %v2403_v35 }
  0xcd   : > { %1278 = vmatprep.mubr.bf16.mxu0 %v2406_v36  ;;  %2215 = vmatmul.mubr.bf16.gmra.mrb[40].mxu1 %v2413_v37 }
  0xce   : > { %2218 = vmatprep.mubr.bf16.mxu1 %v2420_v38 }
  0xd4   : > { %1279 = vmatmul.mubr.bf16.gmra.mrb[44].mxu0 %v2408_v39 }
  0xd5   : > { %1286 = vmatprep.mubr.bf16.mxu0 %v2409_v40  ;;  %2219 = vmatmul.mubr.bf16.gmra.mrb[44].mxu1 %v2421_v41 }
  0xdc   : > { %1287 = vmatmul.mubr.bf16.gmra.mrb[48].mxu0 %v2411_v42 }
  0xdd   : > { %1294 = vmatprep.mubr.bf16.mxu0 %v2414_v43 }
  0xe4   : > { %1295 = vmatmul.mubr.bf16.gmra.mrb[52].mxu0 %v2416_v44 }
  0xe5   : > { %1302 = vmatprep.mubr.bf16.mxu0 %v2417_v45 }
  0xec   : > { %1303 = vmatmul.mubr.bf16.gmra.mrb[56].mxu0 %v2419_v46 }
  0xed   : > { %1310 = vmatprep.mubr.bf16.mxu0 %v2422_v47 }
  0xf4   : > { %1311 = vmatmul.mubr.bf16.gmra.mrb[60].mxu0 %v2424_v48 }
 0x14f   : > { %v1998_v49 = vpop.f32.mrb[0].mxu0 }
 0x150   : > { %v2062_v50 = vpop.f32.mrb[0].mxu1  ;;  %v1999_v51 = vpop.f32.mrb[1].mxu0 }
 0x151   : > { %v2000_v52 = vadd.f32 %v1999_v51, %v1998_v49  ;;  %v2063_v53 = vpop.f32.mrb[1].mxu1  ;;  %v2001_v54 = vpop.f32.mrb[2].mxu0 }
 0x152   : > { %v2064_v55 = vadd.f32 %v2063_v53, %v2062_v50  ;;  %v2065_v56 = vpop.f32.mrb[2].mxu1  ;;  %v2002_v57 = vpop.f32.mrb[3].mxu0 }
 0x153   : > { %v2003_v58 = vadd.f32 %v2002_v57, %v2001_v54  ;;  %v2066_v59 = vpop.f32.mrb[3].mxu1 }
 0x154   : > { %v2775_v60 = vadd.f32 %v2064_v55, %v2000_v52  ;;  %v2067_v61 = vadd.f32 %v2066_v59, %v2065_v56 }
 0x156   : > { %v2777_v62 = vadd.f32 %v2067_v61, %v2003_v58 }
 0x157   : > { %v2004_v63 = vpop.f32.mrb[4].mxu0 }
 0x158   : > { %v2068_v0 = vpop.f32.mrb[4].mxu1  ;;  %v2005_v1 = vpop.f32.mrb[5].mxu0 }
 0x159   : > { %v2006_v2 = vadd.f32 %v2005_v1, %v2004_v63  ;;  %v2069_v3 = vpop.f32.mrb[5].mxu1  ;;  %v2007_v4 = vpop.f32.mrb[6].mxu0 }
 0x15a   : > { %v2070_v5 = vadd.f32 %v2069_v3, %v2068_v0  ;;  %v2071_v6 = vpop.f32.mrb[6].mxu1  ;;  %v2008_v7 = vpop.f32.mrb[7].mxu0 }
 0x15b   : > { %v2009_v8 = vadd.f32 %v2008_v7, %v2007_v4  ;;  %v2072_v9 = vpop.f32.mrb[7].mxu1 }
 0x15c   : > { %v2779_v10 = vadd.f32 %v2070_v5, %v2006_v2  ;;  %v2073_v11 = vadd.f32 %v2072_v9, %v2071_v6 }
 0x15e   : > { %v2781_v12 = vadd.f32 %v2073_v11, %v2009_v8 }
 0x15f   : > { %v2010_v13 = vpop.f32.mrb[8].mxu0 }
 0x160   : > { %v2074_v14 = vpop.f32.mrb[8].mxu1  ;;  %v2011_v15 = vpop.f32.mrb[9].mxu0 }
 0x161   : > { %v2012_v16 = vadd.f32 %v2011_v15, %v2010_v13  ;;  %v2075_v17 = vpop.f32.mrb[9].mxu1  ;;  %v2013_v18 = vpop.f32.mrb[10].mxu0 }
 0x162   : > { %v2076_v19 = vadd.f32 %v2075_v17, %v2074_v14  ;;  %v2077_v20 = vpop.f32.mrb[10].mxu1  ;;  %v2014_v21 = vpop.f32.mrb[11].mxu0 }
 0x163   : > { %v2015_v22 = vadd.f32 %v2014_v21, %v2013_v18  ;;  %v2078_v23 = vpop.f32.mrb[11].mxu1 }
 0x164   : > { %v2783_v24 = vadd.f32 %v2076_v19, %v2012_v16  ;;  %v2079_v25 = vadd.f32 %v2078_v23, %v2077_v20 }
 0x166   : > { %v2785_v26 = vadd.f32 %v2079_v25, %v2015_v22 }
 0x167   : > { %v2016_v27 = vpop.f32.mrb[12].mxu0 }
 0x168   : > { %v2080_v28 = vpop.f32.mrb[12].mxu1  ;;  %v2017_v29 = vpop.f32.mrb[13].mxu0 }
 0x169   : > { %v2018_v30 = vadd.f32 %v2017_v29, %v2016_v27  ;;  %v2081_v31 = vpop.f32.mrb[13].mxu1  ;;  %v2019_v32 = vpop.f32.mrb[14].mxu0 }
 0x16a   : > { %v2082_v33 = vadd.f32 %v2081_v31, %v2080_v28  ;;  %v2083_v34 = vpop.f32.mrb[14].mxu1  ;;  %v2020_v35 = vpop.f32.mrb[15].mxu0 }
 0x16b   : > { %v2021_v36 = vadd.f32 %v2020_v35, %v2019_v32  ;;  %v2084_v37 = vpop.f32.mrb[15].mxu1 }
 0x16c   : > { %v2787_v38 = vadd.f32 %v2082_v33, %v2018_v30  ;;  %v2085_v39 = vadd.f32 %v2084_v37, %v2083_v34 }
 0x16e   : > { %v2789_v40 = vadd.f32 %v2085_v39, %v2021_v36 }
 0x16f   : > { %v2022_v41 = vpop.f32.mrb[16].mxu0 }
 0x170   : > { %v2086_v42 = vpop.f32.mrb[16].mxu1  ;;  %v2023_v43 = vpop.f32.mrb[17].mxu0 }
 0x171   : > { %v2024_v44 = vadd.f32 %v2023_v43, %v2022_v41  ;;  %v2087_v45 = vpop.f32.mrb[17].mxu1  ;;  %v2025_v46 = vpop.f32.mrb[18].mxu0 }
 0x172   : > { %v2088_v47 = vadd.f32 %v2087_v45, %v2086_v42  ;;  %v2089_v48 = vpop.f32.mrb[18].mxu1  ;;  %v2026_v49 = vpop.f32.mrb[19].mxu0 }
 0x173   : > { %v2027_v50 = vadd.f32 %v2026_v49, %v2025_v46  ;;  %v2090_v51 = vpop.f32.mrb[19].mxu1 }
 0x174   : > { %v2791_v52 = vadd.f32 %v2088_v47, %v2024_v44  ;;  %v2091_v53 = vadd.f32 %v2090_v51, %v2089_v48 }
 0x176   : > { %v2793_v54 = vadd.f32 %v2091_v53, %v2027_v50 }
 0x177   : > { %v2028_v55 = vpop.f32.mrb[20].mxu0 }
 0x178   : > { %v2092_v56 = vpop.f32.mrb[20].mxu1  ;;  %v2029_v57 = vpop.f32.mrb[21].mxu0 }
 0x179   : > { %v2030_v58 = vadd.f32 %v2029_v57, %v2028_v55  ;;  %v2093_v59 = vpop.f32.mrb[21].mxu1  ;;  %v2031_v61 = vpop.f32.mrb[22].mxu0 }
 0x17a   : > { %v2094_v63 = vadd.f32 %v2093_v59, %v2092_v56  ;;  %v2095_v0 = vpop.f32.mrb[22].mxu1  ;;  %v2032_v1 = vpop.f32.mrb[23].mxu0 }
 0x17b   : > { %v2033_v2 = vadd.f32 %v2032_v1, %v2031_v61  ;;  %v2096_v3 = vpop.f32.mrb[23].mxu1 }
 0x17c   : > { %v2795_v4 = vadd.f32 %v2094_v63, %v2030_v58  ;;  %v2097_v5 = vadd.f32 %v2096_v3, %v2095_v0 }
 0x17e   : > { %v2797_v6 = vadd.f32 %v2097_v5, %v2033_v2 }
 0x17f   : > { %v2034_v7 = vpop.f32.mrb[24].mxu0 }
 0x180   : > { %v2098_v8 = vpop.f32.mrb[24].mxu1  ;;  %v2035_v9 = vpop.f32.mrb[25].mxu0 }
 0x181   : > { %v2036_v11 = vadd.f32 %v2035_v9, %v2034_v7  ;;  %v2099_v13 = vpop.f32.mrb[25].mxu1  ;;  %v2037_v14 = vpop.f32.mrb[26].mxu0 }
 0x182   : > { %v2100_v15 = vadd.f32 %v2099_v13, %v2098_v8  ;;  %v2101_v16 = vpop.f32.mrb[26].mxu1  ;;  %v2038_v17 = vpop.f32.mrb[27].mxu0 }
 0x183   : > { %v2039_v18 = vadd.f32 %v2038_v17, %v2037_v14  ;;  %v2102_v19 = vpop.f32.mrb[27].mxu1 }
 0x184   : > { %v2799_v20 = vadd.f32 %v2100_v15, %v2036_v11  ;;  %v2103_v21 = vadd.f32 %v2102_v19, %v2101_v16 }
 0x186   : > { %v2801_v22 = vadd.f32 %v2103_v21, %v2039_v18 }
 0x187   : > { %v2040_v23 = vpop.f32.mrb[28].mxu0 }
 0x188   : > { %v2104_v25 = vpop.f32.mrb[28].mxu1  ;;  %v2041_v27 = vpop.f32.mrb[29].mxu0 }
 0x189   : > { %v2042_v28 = vadd.f32 %v2041_v27, %v2040_v23  ;;  %v2105_v29 = vpop.f32.mrb[29].mxu1  ;;  %v2043_v30 = vpop.f32.mrb[30].mxu0 }
 0x18a   : > { %v2106_v31 = vadd.f32 %v2105_v29, %v2104_v25  ;;  %v2107_v32 = vpop.f32.mrb[30].mxu1  ;;  %v2044_v33 = vpop.f32.mrb[31].mxu0 }
 0x18b   : > { %v2045_v34 = vadd.f32 %v2044_v33, %v2043_v30  ;;  %v2108_v35 = vpop.f32.mrb[31].mxu1 }
 0x18c   : > { %v2803_v36 = vadd.f32 %v2106_v31, %v2042_v28  ;;  %v2109_v37 = vadd.f32 %v2108_v35, %v2107_v32 }
 0x18e   : > { %v2805_v39 = vadd.f32 %v2109_v37, %v2045_v34 }
 0x18f   : > { %v2126_v41 = vpop.f32.mrb[32].mxu0 }
 0x190   : > { %v2127_v42 = vpop.f32.mrb[33].mxu0  ;;  %v2208_v43 = vpop.f32.mrb[32].mxu1 }
 0x191   : > { %v2128_v44 = vadd.f32 %v2127_v42, %v2126_v41  ;;  %v2129_v45 = vpop.f32.mrb[34].mxu0  ;;  %v1353_v46 = vpop.f32.mrb[33].mxu1 }
 0x192   : > { %v2130_v47 = vpop.f32.mrb[35].mxu0  ;;  %v2209_v48 = vpop.f32.mrb[34].mxu1 }
 0x193   : > { %v2131_v49 = vadd.f32 %v2130_v47, %v2129_v45  ;;  %v1257_v50 = vadd.f32 %v2128_v44, %v2775_v60  ;;  %v1356_v51 = vpop.f32.mrb[35].mxu1 }
 0x195   : > { %v1354_v53 = vadd.f32 %v1353_v46, %v1257_v50  ;;  %v1260_v55 = vadd.f32 %v2131_v49, %v2777_v62 }
 0x197   : > { %1482 = vst [vmem:[%s2810_s21] sm:$0xff] %v1354_v53  ;;  %v1357_v56 = vadd.f32 %v1356_v51, %v1260_v55  ;;  %v2132_v57 = vpop.f32.mrb[36].mxu0  ;;  %v1441_v61 = vmul.f32 %v1354_v53, %v1354_v53 }
 0x198   : > { %v2133_v58 = vpop.f32.mrb[37].mxu0  ;;  %v2212_v59 = vpop.f32.mrb[36].mxu1 }
 0x199   : > { %v1417_v63 = vadd.f32 %v1357_v56, %v1354_v53  ;;  %v1442_v0 = vmul.f32 %v1357_v56, %v1357_v56  ;;  %1483 = vst [vmem:[%s2810_s21 + $0x8] sm:$0xff] %v1357_v56  ;;  %v2134_v1 = vadd.f32 %v2133_v58, %v2132_v57  ;;  %v2135_v60 = vpop.f32.mrb[38].mxu0  ;;  %v1369_v2 = vpop.f32.mrb[37].mxu1 }
 0x19a   : > { %v2136_v3 = vpop.f32.mrb[39].mxu0  ;;  %v2213_v62 = vpop.f32.mrb[38].mxu1 }
 0x19b   : > { %v1457_v5 = vadd.f32 %v1442_v0, %v1441_v61  ;;  %v1265_v7 = vadd.f32 %v2134_v1, %v2779_v10  ;;  %v2137_v8 = vadd.f32 %v2136_v3, %v2135_v60  ;;  %v1372_v9 = vpop.f32.mrb[39].mxu1 }
 0x19d   : > { %v1362_v11 = vadd.f32 %v2208_v43, %v1265_v7  ;;  %v1268_v13 = vadd.f32 %v2137_v8, %v2781_v12 }
 0x19f   : > { %v1443_v14 = vmul.f32 %v1362_v11, %v1362_v11  ;;  %1484 = vst [vmem:[%s2810_s21 + $0x10] sm:$0xff] %v1362_v11  ;;  %v1365_v15 = vadd.f32 %v2209_v48, %v1268_v13  ;;  %v2138_v16 = vpop.f32.mrb[40].mxu0  ;;  %v1418_v17 = vadd.f32 %v1417_v63, %v1362_v11 }
 0x1a0   : > { %v2139_v18 = vpop.f32.mrb[41].mxu0  ;;  %v2817_v19 = vpop.f32.mrb[40].mxu1 }
 0x1a1   : > { %v1444_v21 = vmul.f32 %v1365_v15, %v1365_v15  ;;  %1485 = vst [vmem:[%s2810_s21 + $0x18] sm:$0xff] %v1365_v15  ;;  %v2140_v23 = vadd.f32 %v2139_v18, %v2138_v16  ;;  %v2141_v25 = vpop.f32.mrb[42].mxu0  ;;  %v1419_v27 = vadd.f32 %v1418_v17, %v1365_v15  ;;  %v1458_v10 = vadd.f32 %v1457_v5, %v1443_v14  ;;  %v1385_v28 = vpop.f32.mrb[41].mxu1 }
 0x1a2   : > { %v2142_v29 = vpop.f32.mrb[43].mxu0  ;;  %v2820_v30 = vpop.f32.mrb[42].mxu1 }
 0x1a3   : > { %v2143_v12 = vadd.f32 %v2142_v29, %v2141_v25  ;;  %v1273_v31 = vadd.f32 %v2140_v23, %v2783_v24  ;;  %v1459_v32 = vadd.f32 %v1458_v10, %v1444_v21  ;;  %v1388_v33 = vpop.f32.mrb[43].mxu1 }
 0x1a5   : > { %v1370_v34 = vadd.f32 %v1369_v2, %v1273_v31  ;;  %v1276_v35 = vadd.f32 %v2143_v12, %v2785_v26 }
 0x1a7   : > { %v1420_v37 = vadd.f32 %v1419_v27, %v1370_v34  ;;  %v1445_v41 = vmul.f32 %v1370_v34, %v1370_v34  ;;  %1486 = vst [vmem:[%s2810_s21 + $0x20] sm:$0xff] %v1370_v34  ;;  %v1373_v42 = vadd.f32 %v1372_v9, %v1276_v35  ;;  %v2144_v43 = vpop.f32.mrb[44].mxu0 }
 0x1a8   : > { %v2145_v44 = vpop.f32.mrb[45].mxu0  ;;  %v2825_v45 = vpop.f32.mrb[44].mxu1 }
 0x1a9   : > { %v1460_v46 = vadd.f32 %v1459_v32, %v1445_v41  ;;  %v1421_v47 = vadd.f32 %v1420_v37, %v1373_v42  ;;  %v1446_v48 = vmul.f32 %v1373_v42, %v1373_v42  ;;  %1487 = vst [vmem:[%s2810_s21 + $0x28] sm:$0xff] %v1373_v42  ;;  %v2146_v49 = vadd.f32 %v2145_v44, %v2144_v43  ;;  %v2147_v24 = vpop.f32.mrb[46].mxu0  ;;  %v1401_v50 = vpop.f32.mrb[45].mxu1 }
 0x1aa   : > { %v2148_v51 = vpop.f32.mrb[47].mxu0  ;;  %v2828_v53 = vpop.f32.mrb[46].mxu1 }
 0x1ab   : > { %v1461_v26 = vadd.f32 %v1460_v46, %v1446_v48  ;;  %v1281_v55 = vadd.f32 %v2146_v49, %v2787_v38  ;;  %v2149_v56 = vadd.f32 %v2148_v51, %v2147_v24  ;;  %v1404_v57 = vpop.f32.mrb[47].mxu1 }
 0x1ad   : > { %v1378_v58 = vadd.f32 %v2212_v59, %v1281_v55  ;;  %v1284_v61 = vadd.f32 %v2149_v56, %v2789_v40 }
 0x1af   : > { %v1447_v63 = vmul.f32 %v1378_v58, %v1378_v58  ;;  %1488 = vst [vmem:[%s2810_s21 + $0x30] sm:$0xff] %v1378_v58  ;;  %v1381_v0 = vadd.f32 %v2213_v62, %v1284_v61  ;;  %v2150_v1 = vpop.f32.mrb[48].mxu0  ;;  %v1422_v60 = vadd.f32 %v1421_v47, %v1378_v58 }
 0x1b0   : > { %v2151_v2 = vpop.f32.mrb[49].mxu0 }
 0x1b1   : > { %v1448_v3 = vmul.f32 %v1381_v0, %v1381_v0  ;;  %1489 = vst [vmem:[%s2810_s21 + $0x38] sm:$0xff] %v1381_v0  ;;  %v2152_v5 = vadd.f32 %v2151_v2, %v2150_v1  ;;  %v2153_v7 = vpop.f32.mrb[50].mxu0  ;;  %v1423_v8 = vadd.f32 %v1422_v60, %v1381_v0  ;;  %v1462_v9 = vadd.f32 %v1461_v26, %v1447_v63 }
 0x1b2   : > { %v2154_v38 = vpop.f32.mrb[51].mxu0 }
 0x1b3   : > { %v2155_v11 = vadd.f32 %v2154_v38, %v2153_v7  ;;  %v1289_v59 = vadd.f32 %v2152_v5, %v2791_v52  ;;  %v1463_v13 = vadd.f32 %v1462_v9, %v1448_v3 }
 0x1b5   : > { %v1386_v40 = vadd.f32 %v1385_v28, %v1289_v59  ;;  %v1292_v14 = vadd.f32 %v2155_v11, %v2793_v54 }
 0x1b7   : > { %v1424_v62 = vadd.f32 %v1423_v8, %v1386_v40  ;;  %v1449_v15 = vmul.f32 %v1386_v40, %v1386_v40  ;;  %1490 = vst [vmem:[%s2810_s21 + $0x40] sm:$0xff] %v1386_v40  ;;  %v1389_v16 = vadd.f32 %v1388_v33, %v1292_v14  ;;  %v2156_v17 = vpop.f32.mrb[52].mxu0 }
 0x1b8   : > { %v2157_v18 = vpop.f32.mrb[53].mxu0 }
 0x1b9   : > { %v1464_v21 = vadd.f32 %v1463_v13, %v1449_v15  ;;  %v1425_v23 = vadd.f32 %v1424_v62, %v1389_v16  ;;  %v1450_v25 = vmul.f32 %v1389_v16, %v1389_v16  ;;  %1491 = vst [vmem:[%s2810_s21 + $0x48] sm:$0xff] %v1389_v16  ;;  %v2158_v27 = vadd.f32 %v2157_v18, %v2156_v17  ;;  %v2159_v10 = vpop.f32.mrb[54].mxu0  ;;  %v1440_v18 = vld [vmem:[#allocation3] sm:$0x1] }
 0x1ba   : > { %v2160_v29 = vpop.f32.mrb[55].mxu0 }
 0x1bb   : > { %v1465_v52 = vadd.f32 %v1464_v21, %v1450_v25  ;;  %v1297_v28 = vadd.f32 %v2158_v27, %v2795_v4  ;;  %v2161_v12 = vadd.f32 %v2160_v29, %v2159_v10 }
 0x1bd   : > { %v1394_v54 = vadd.f32 %v2817_v19, %v1297_v28  ;;  %v1300_v31 = vadd.f32 %v2161_v12, %v2797_v6 }
 0x1bf   : > { %v1451_v32 = vmul.f32 %v1394_v54, %v1394_v54  ;;  %1492 = vst [vmem:[%s2810_s21 + $0x50] sm:$0xff] %v1394_v54  ;;  %v1397_v33 = vadd.f32 %v2820_v30, %v1300_v31  ;;  %v2162_v34 = vpop.f32.mrb[56].mxu0  ;;  %v1426_v35 = vadd.f32 %v1425_v23, %v1394_v54  ;;  %v1580_v54 = vlaneseq (!%p1977_p9) }
 0x1c0   : > { %v2163_v37 = vpop.f32.mrb[57].mxu0 }
 0x1c1   : > { %v1452_v41 = vmul.f32 %v1397_v33, %v1397_v33  ;;  %1493 = vst [vmem:[%s2810_s21 + $0x58] sm:$0xff] %v1397_v33  ;;  %v2164_v42 = vadd.f32 %v2163_v37, %v2162_v34  ;;  %v2165_v43 = vpop.f32.mrb[58].mxu0  ;;  %v1427_v44 = vadd.f32 %v1426_v35, %v1397_v33  ;;  %v1466_v46 = vadd.f32 %v1465_v52, %v1451_v32  ;;  %v1508_v32 = vld [vmem:[%s3031_s2] sm:$0x1] (!%p1977_p9) }
 0x1c2   : > { %v2166_v4 = vpop.f32.mrb[59].mxu0  ;;  %v1581_v31 = vshrl.u32 (!%p1977_p9), %v1580_v54, 7  ;;  %v1512_v37 = vld [vmem:[%s3032_s3] sm:$0x1] (!%p1977_p9) }
 0x1c3   : > { %v2167_v47 = vadd.f32 %v2166_v4, %v2165_v43  ;;  %v1305_v19 = vadd.f32 %v2164_v42, %v2799_v20  ;;  %v1467_v6 = vadd.f32 %v1466_v46, %v1452_v41 }
 0x1c4   : > { %v1582_v33 = vsub.s32 (!%p1977_p9), 0, %v1581_v31 }
 0x1c5   : > { %v1402_v48 = vadd.f32 %v1401_v50, %v1305_v19  ;;  %v1308_v49 = vadd.f32 %v2167_v47, %v2801_v22 }
 0x1c7   : > { %v1428_v30 = vadd.f32 %v1427_v44, %v1402_v48  ;;  %v1453_v24 = vmul.f32 %v1402_v48, %v1402_v48  ;;  %1494 = vst [vmem:[%s2810_s21 + $0x60] sm:$0xff] %v1402_v48  ;;  %v1405_v51 = vadd.f32 %v1404_v57, %v1308_v49  ;;  %v2168_v26 = vpop.f32.mrb[60].mxu0 }
 0x1c8   : > { %v2169_v55 = vpop.f32.mrb[61].mxu0 }
 0x1c9   : > { %v1468_v56 = vadd.f32 %v1467_v6, %v1453_v24  ;;  %v1429_v58 = vadd.f32 %v1428_v30, %v1405_v51  ;;  %v1454_v61 = vmul.f32 %v1405_v51, %v1405_v51  ;;  %1495 = vst [vmem:[%s2810_s21 + $0x68] sm:$0xff] %v1405_v51  ;;  %v2170_v63 = vadd.f32 %v2169_v55, %v2168_v26  ;;  %v2171_v0 = vpop.f32.mrb[62].mxu0 }
 0x1ca   : > { %v2172_v1 = vpop.f32.mrb[63].mxu0 }
 0x1cb   : > { %v1469_v20 = vadd.f32 %v1468_v56, %v1454_v61  ;;  %v1313_v50 = vadd.f32 %v2170_v63, %v2803_v36  ;;  %v2173_v60 = vadd.f32 %v2172_v1, %v2171_v0 }
 0x1cd   : > { %v1410_v22 = vadd.f32 %v2825_v45, %v1313_v50  ;;  %v1316_v2 = vadd.f32 %v2173_v60, %v2805_v39  ;;  %v1416_v39 = vld [vmem:[#allocation2] sm:$0x1] }
 0x1cf   : > { %v1430_v57 = vadd.f32 %v1429_v58, %v1410_v22  ;;  %v1455_v3 = vmul.f32 %v1410_v22, %v1410_v22  ;;  %1496 = vst [vmem:[%s2810_s21 + $0x70] sm:$0xff] %v1410_v22  ;;  %v1413_v5 = vadd.f32 %v2828_v53, %v1316_v2 }
 0x1d1   : > { %v1470_v7 = vadd.f32 %v1469_v20, %v1455_v3  ;;  %v1431_v8 = vadd.f32 %v1430_v57, %v1413_v5  ;;  %v1456_v9 = vmul.f32 %v1413_v5, %v1413_v5  ;;  %1497 = vst [vmem:[%s2810_s21 + $0x78] sm:$0xff] %v1413_v5 }
 0x1d3   : > { %v1432_v38 = vrot.slane %v1431_v8, 4  ;;  %v1471_v11 = vadd.f32 %v1470_v7, %v1456_v9 }
 0x1d5   : > { %v1433_v59 = vadd.f32 %v1432_v38, %v1431_v8  ;;  %v1472_v13 = vrot.slane %v1471_v11, 4 }
 0x1d7   : > { %v1434_v40 = vrot.slane %v1433_v59, 2  ;;  %v1473_v36 = vadd.f32 %v1472_v13, %v1471_v11 }
 0x1d8   : > { %v1515_v41 = vld [vmem:[#allocation9] sm:$0xff] (!%p1977_p9)  ;;  %v1516_v42 = vld [vmem:[#allocation9 + $0x8] sm:$0xff] (!%p1977_p9)  ;;  %v1517_v43 = vld [vmem:[#allocation9 + $0x10] sm:$0xff] (!%p1977_p9) }
 0x1d9   : > { %v1435_v14 = vadd.f32 %v1434_v40, %v1433_v59  ;;  %v1474_v62 = vrot.slane %v1473_v36, 2  ;;  %v1518_v44 = vld [vmem:[#allocation9 + $0x18] sm:$0xff] (!%p1977_p9)  ;;  %v1519_v46 = vld [vmem:[#allocation9 + $0x20] sm:$0xff] (!%p1977_p9)  ;;  %v1520_v19 = vld [vmem:[#allocation9 + $0x28] sm:$0xff] (!%p1977_p9) }
 0x1da   : > { %v1521_v6 = vld [vmem:[#allocation9 + $0x30] sm:$0xff] (!%p1977_p9)  ;;  %v1522_v48 = vld [vmem:[#allocation9 + $0x38] sm:$0xff] (!%p1977_p9)  ;;  %v1523_v49 = vld [vmem:[#allocation9 + $0x40] sm:$0xff] (!%p1977_p9) }
 0x1db   : > { %v1436_v45 = vrot.slane %v1435_v14, 1  ;;  %v1475_v15 = vadd.f32 %v1474_v62, %v1473_v36  ;;  %v1524_v30 = vld [vmem:[#allocation9 + $0x48] sm:$0xff] (!%p1977_p9)  ;;  %v1525_v24 = vld [vmem:[#allocation9 + $0x50] sm:$0xff] (!%p1977_p9)  ;;  %v1526_v58 = vld [vmem:[#allocation9 + $0x58] sm:$0xff] (!%p1977_p9) }
 0x1dc   : > { %v1527_v61 = vld [vmem:[#allocation9 + $0x60] sm:$0xff] (!%p1977_p9)  ;;  %v1528_v63 = vld [vmem:[#allocation9 + $0x68] sm:$0xff] (!%p1977_p9)  ;;  %v1529_v13 = vld [vmem:[#allocation9 + $0x70] sm:$0xff] (!%p1977_p9) }
 0x1dd   : > { %v1437_v16 = vadd.f32 %v1436_v45, %v1435_v14  ;;  %v1476_v17 = vrot.slane %v1475_v15, 1  ;;  %1501 = sbr.rel (%p1977_p9) target bundleno = 555 (0x22b), region = 52  ;;  %v1530_v40 = vld [vmem:[#allocation9 + $0x78] sm:$0xff] (!%p1977_p9)  ;;  %v1531_v36 = vld [vmem:[#allocation9 + $0x80] sm:$0xff] (!%p1977_p9) }
 0x1df   : > { %v1438_v21 = vadd.f32 %v1437_v16, %v1416_v39  ;;  %v1477_v53 = vadd.f32 %v1476_v17, %v1475_v15  ;;  %v1532_v39 = vld [vmem:[#allocation9 + $0x88] sm:$0xff] (!%p1977_p9)  ;;  %v1533_v16 = vld [vmem:[#allocation9 + $0x90] sm:$0xff] (!%p1977_p9)  ;;  %v1534_v17 = vld [vmem:[#allocation9 + $0x98] sm:$0xff] (!%p1977_p9) }
 0x1e1   : > { %1439 = vst [vmem:[#allocation2] sm:$0x1] %v1438_v21  ;;  %v1478_v23 = vadd.f32 %v1477_v53, %v1440_v18 }
 0x1e3   : > { %1479 = vst [vmem:[#allocation3] sm:$0x1] %v1478_v23 }
 0x1e8   : > { %v1502_v25 = vld [vmem:[#allocation2] sm:$0x1] }
 0x1e9   : > { %v1503_v10 = vmul.f32 0.0025510204, %v1502_v25  ;;  %v1535_v25 = vld [vmem:[#allocation9 + $0xa0] sm:$0xff] }
 0x1ea   : > { %v1504_v27 = vld [vmem:[#allocation3] sm:$0x1] }
 0x1eb   : > { %v1505_v29 = vmul.f32 0.0025510204, %v1504_v27  ;;  %v1506_v52 = vmul.f32 %v1503_v10, %v1503_v10  ;;  %v1536_v27 = vld [vmem:[#allocation9 + $0xa8] sm:$0xff] }
 0x1ed   : > { %v1507_v28 = vsub.f32 %v1505_v29, %v1506_v52 }
 0x1ef   : > { %v1509_v12 = vadd.f32 1e-05, %v1507_v28 }
 0x1f1   : > { %2425 = vrsqrt.f32 %v1509_v12 }
 0x1fb   : > { %v2426_v34 = vpop.eup %2425 }
 0x1fc   : > { %v1511_v35 = vmul.f32 %v2426_v34, %v1508_v32  ;;  %v1538_v34 = vld [vmem:[#allocation9 + $0xb8] sm:$0xff] }
 0x1fe   : > { %v1513_v4 = vmul.f32 %v1511_v35, %v1503_v10  ;;  %v2861_v47 = vrot.slane %v1511_v35, %v1582_v33  ;;  %v1539_v35 = vld [vmem:[#allocation9 + $0xc0] sm:$0xff] }
 0x200   : > { %v1514_v51 = vsub.f32 %v1512_v37, %v1513_v4  ;;  %v1585_v26 = vmul.f32 %v2861_v47, %v1515_v41  ;;  %v1586_v55 = vmul.f32 %v2861_v47, %v1516_v42  ;;  %v1587_v56 = vmul.f32 %v2861_v47, %v1517_v43  ;;  %v1542_v4 = vld [vmem:[#allocation9 + $0xd8] sm:$0xff] }
 0x201   : > { %v1588_v0 = vmul.f32 %v2861_v47, %v1518_v44  ;;  %v1589_v1 = vmul.f32 %v2861_v47, %v1519_v46  ;;  %v1590_v20 = vmul.f32 %v2861_v47, %v1520_v19  ;;  %v1591_v50 = vmul.f32 %v2861_v47, %v1521_v6  ;;  %v1540_v44 = vld [vmem:[#allocation9 + $0xc8] sm:$0xff]  ;;  %v1541_v46 = vld [vmem:[#allocation9 + $0xd0] sm:$0xff] }
 0x202   : > { %v2870_v60 = vrot.slane %v1514_v51, %v1582_v33  ;;  %v1592_v22 = vmul.f32 %v2861_v47, %v1522_v48  ;;  %v1593_v2 = vmul.f32 %v2861_v47, %v1523_v49  ;;  %v1594_v57 = vmul.f32 %v2861_v47, %v1524_v30  ;;  %v1537_v33 = vld [vmem:[#allocation9 + $0xb0] sm:$0xff]  ;;  %v1543_v30 = vld [vmem:[#allocation9 + $0xe0] sm:$0xff] }
 0x203   : > { %v1595_v3 = vmul.f32 %v2861_v47, %v1525_v24  ;;  %v1596_v5 = vmul.f32 %v2861_v47, %v1526_v58  ;;  %v1597_v7 = vmul.f32 %v2861_v47, %v1527_v61  ;;  %v1598_v8 = vmul.f32 %v2861_v47, %v1528_v63  ;;  %v1544_v24 = vld [vmem:[#allocation9 + $0xe8] sm:$0xff] }
 0x204   : > { %v1655_v9 = vadd.f32 %v2870_v60, %v1585_v26  ;;  %v1656_v38 = vadd.f32 %v2870_v60, %v1586_v55  ;;  %v1657_v11 = vadd.f32 %v2870_v60, %v1587_v56  ;;  %v1658_v59 = vadd.f32 %v2870_v60, %v1588_v0 }
 0x205   : > { %v1659_v14 = vadd.f32 %v2870_v60, %v1589_v1  ;;  %v1660_v62 = vadd.f32 %v2870_v60, %v1590_v20  ;;  %v1661_v45 = vadd.f32 %v2870_v60, %v1591_v50  ;;  %v1662_v15 = vadd.f32 %v2870_v60, %v1592_v22  ;;  %v1545_v1 = vld [vmem:[#allocation9 + $0xf0] sm:$0xff]  ;;  %v1546_v20 = vld [vmem:[#allocation9 + $0xf8] sm:$0xff]  ;;  %v1547_v50 = vld [vmem:[#allocation9 + $0x100] sm:$0xff] }
 0x206   : > { %1719 = vst [vmem:[#allocation9] sm:$0xff] %v1655_v9  ;;  %1720 = vst [vmem:[#allocation9 + $0x8] sm:$0xff] %v1656_v38  ;;  %v1663_v18 = vadd.f32 %v2870_v60, %v1593_v2  ;;  %v1664_v21 = vadd.f32 %v2870_v60, %v1594_v57  ;;  %v1665_v53 = vadd.f32 %v2870_v60, %v1595_v3 }
 0x207   : > { %1721 = vst [vmem:[#allocation9 + $0x10] sm:$0xff] %v1657_v11  ;;  %1722 = vst [vmem:[#allocation9 + $0x18] sm:$0xff] %v1658_v59  ;;  %v1666_v23 = vadd.f32 %v2870_v60, %v1596_v5  ;;  %v1667_v10 = vadd.f32 %v2870_v60, %v1597_v7  ;;  %v1668_v29 = vadd.f32 %v2870_v60, %v1598_v8  ;;  %v1548_v5 = vld [vmem:[#allocation9 + $0x108] sm:$0xff]  ;;  %v1549_v7 = vld [vmem:[#allocation9 + $0x110] sm:$0xff] }
 0x208   : > { %1723 = vst [vmem:[#allocation9 + $0x20] sm:$0xff] %v1659_v14  ;;  %1724 = vst [vmem:[#allocation9 + $0x28] sm:$0xff] %v1660_v62  ;;  %v1599_v52 = vmul.f32 %v2861_v47, %v1529_v13  ;;  %v1600_v28 = vmul.f32 %v2861_v47, %v1530_v40  ;;  %v1601_v12 = vmul.f32 %v2861_v47, %v1531_v36  ;;  %v1550_v8 = vld [vmem:[#allocation9 + $0x118] sm:$0xff]  ;;  %v1551_v13 = vld [vmem:[#allocation9 + $0x120] sm:$0xff] }
 0x209   : > { %1725 = vst [vmem:[#allocation9 + $0x30] sm:$0xff] %v1661_v45  ;;  %1726 = vst [vmem:[#allocation9 + $0x38] sm:$0xff] %v1662_v15  ;;  %v1602_v54 = vmul.f32 %v2861_v47, %v1532_v39  ;;  %v1603_v31 = vmul.f32 %v2861_v47, %v1533_v16  ;;  %v1604_v32 = vmul.f32 %v2861_v47, %v1534_v17  ;;  %v1552_v40 = vld [vmem:[#allocation9 + $0x128] sm:$0xff] }
 0x20a   : > { %1727 = vst [vmem:[#allocation9 + $0x40] sm:$0xff] %v1663_v18  ;;  %1728 = vst [vmem:[#allocation9 + $0x48] sm:$0xff] %v1664_v21  ;;  %v1669_v37 = vadd.f32 %v2870_v60, %v1599_v52  ;;  %v1670_v41 = vadd.f32 %v2870_v60, %v1600_v28  ;;  %v1605_v42 = vmul.f32 %v2861_v47, %v1535_v25  ;;  %v1553_v18 = vld [vmem:[#allocation9 + $0x130] sm:$0xff]  ;;  %v1554_v21 = vld [vmem:[#allocation9 + $0x138] sm:$0xff] }
 0x20b   : > { %1729 = vst [vmem:[#allocation9 + $0x50] sm:$0xff] %v1665_v53  ;;  %1730 = vst [vmem:[#allocation9 + $0x58] sm:$0xff] %v1666_v23  ;;  %v1606_v43 = vmul.f32 %v2861_v47, %v1536_v27  ;;  %v1671_v19 = vadd.f32 %v2870_v60, %v1601_v12  ;;  %v1672_v6 = vadd.f32 %v2870_v60, %v1602_v54  ;;  %v1555_v53 = vld [vmem:[#allocation9 + $0x140] sm:$0xff]  ;;  %v1557_v52 = vld [vmem:[#allocation9 + $0x150] sm:$0xff] }
 0x20c   : > { %1731 = vst [vmem:[#allocation9 + $0x60] sm:$0xff] %v1667_v10  ;;  %1732 = vst [vmem:[#allocation9 + $0x68] sm:$0xff] %v1668_v29  ;;  %v1673_v48 = vadd.f32 %v2870_v60, %v1603_v31  ;;  %v1674_v49 = vadd.f32 %v2870_v60, %v1604_v32  ;;  %v1675_v51 = vadd.f32 %v2870_v60, %v1605_v42  ;;  %v1556_v29 = vld [vmem:[#allocation9 + $0x148] sm:$0xff]  ;;  %v1558_v28 = vld [vmem:[#allocation9 + $0x158] sm:$0xff] }
 0x20d   : > { %1733 = vst [vmem:[#allocation9 + $0x70] sm:$0xff] %v1669_v37  ;;  %1734 = vst [vmem:[#allocation9 + $0x78] sm:$0xff] %v1670_v41  ;;  %v1676_v26 = vadd.f32 %v2870_v60, %v1606_v43  ;;  %v1607_v55 = vmul.f32 %v2861_v47, %v1537_v33  ;;  %v1608_v56 = vmul.f32 %v2861_v47, %v1538_v34  ;;  %v1559_v33 = vld [vmem:[#allocation9 + $0x160] sm:$0xff]  ;;  %v1560_v34 = vld [vmem:[#allocation9 + $0x168] sm:$0xff] }
 0x20e   : > { %1735 = vst [vmem:[#allocation9 + $0x80] sm:$0xff] %v1671_v19  ;;  %1736 = vst [vmem:[#allocation9 + $0x88] sm:$0xff] %v1672_v6  ;;  %v1609_v58 = vmul.f32 %v2861_v47, %v1539_v35  ;;  %v1610_v61 = vmul.f32 %v2861_v47, %v1540_v44  ;;  %v1611_v63 = vmul.f32 %v2861_v47, %v1541_v46  ;;  %v1561_v19 = vld [vmem:[#allocation9 + $0x170] sm:$0xff]  ;;  %v1562_v6 = vld [vmem:[#allocation9 + $0x178] sm:$0xff] }
 0x20f   : > { %1737 = vst [vmem:[#allocation9 + $0x90] sm:$0xff] %v1673_v48  ;;  %1738 = vst [vmem:[#allocation9 + $0x98] sm:$0xff] %v1674_v49  ;;  %v1612_v0 = vmul.f32 %v2861_v47, %v1542_v4  ;;  %v1677_v22 = vadd.f32 %v2870_v60, %v1607_v55  ;;  %v1678_v2 = vadd.f32 %v2870_v60, %v1608_v56  ;;  %v1563_v48 = vld [vmem:[#allocation9 + $0x180] sm:$0xff]  ;;  %v1565_v55 = vld [vmem:[#allocation9 + $0x190] sm:$0xff] }
 0x210   : > { %1739 = vst [vmem:[#allocation9 + $0xa0] sm:$0xff] %v1675_v51  ;;  %1740 = vst [vmem:[#allocation9 + $0xa8] sm:$0xff] %v1676_v26  ;;  %v1613_v57 = vmul.f32 %v2861_v47, %v1543_v30  ;;  %v1614_v3 = vmul.f32 %v2861_v47, %v1544_v24  ;;  %v1679_v9 = vadd.f32 %v2870_v60, %v1609_v58  ;;  %v1564_v26 = vld [vmem:[#allocation9 + $0x188] sm:$0xff]  ;;  %v1566_v56 = vld [vmem:[#allocation9 + $0x198] sm:$0xff] }
 0x211   : > { %v1680_v38 = vadd.f32 %v2870_v60, %v1610_v61  ;;  %v1681_v11 = vadd.f32 %v2870_v60, %v1611_v63  ;;  %v1682_v59 = vadd.f32 %v2870_v60, %v1612_v0  ;;  %1741 = vst [vmem:[#allocation9 + $0xb0] sm:$0xff] %v1677_v22  ;;  %1742 = vst [vmem:[#allocation9 + $0xb8] sm:$0xff] %v1678_v2 }
 0x212   : > { %v1683_v36 = vadd.f32 %v2870_v60, %v1613_v57  ;;  %v1684_v14 = vadd.f32 %v2870_v60, %v1614_v3  ;;  %v1615_v62 = vmul.f32 %v2861_v47, %v1545_v1  ;;  %v1616_v45 = vmul.f32 %v2861_v47, %v1546_v20  ;;  %1743 = vst [vmem:[#allocation9 + $0xc0] sm:$0xff] %v1679_v9  ;;  %v1567_v1 = vld [vmem:[#allocation9 + $0x1a0] sm:$0xff]  ;;  %v1568_v20 = vld [vmem:[#allocation9 + $0x1a8] sm:$0xff]  ;;  %v1569_v9 = vld [vmem:[#allocation9 + $0x1b0] sm:$0xff] }
 0x213   : > { %1744 = vst [vmem:[#allocation9 + $0xc8] sm:$0xff] %v1680_v38  ;;  %1745 = vst [vmem:[#allocation9 + $0xd0] sm:$0xff] %v1681_v11  ;;  %v1617_v15 = vmul.f32 %v2861_v47, %v1547_v50  ;;  %v1618_v39 = vmul.f32 %v2861_v47, %v1548_v5  ;;  %v1619_v16 = vmul.f32 %v2861_v47, %v1549_v7  ;;  %v1570_v38 = vld [vmem:[#allocation9 + $0x1b8] sm:$0xff]  ;;  %v1571_v11 = vld [vmem:[#allocation9 + $0x1c0] sm:$0xff] }
 0x214   : > { %1746 = vst [vmem:[#allocation9 + $0xd8] sm:$0xff] %v1682_v59  ;;  %v1620_v17 = vmul.f32 %v2861_v47, %v1550_v8  ;;  %1747 = vst [vmem:[#allocation9 + $0xe0] sm:$0xff] %v1683_v36  ;;  %v1685_v23 = vadd.f32 %v2870_v60, %v1615_v62  ;;  %v1686_v25 = vadd.f32 %v2870_v60, %v1616_v45  ;;  %v1573_v62 = vld [vmem:[#allocation9 + $0x1d0] sm:$0xff]  ;;  %v1574_v45 = vld [vmem:[#allocation9 + $0x1d8] sm:$0xff] }
 0x215   : > { %1748 = vst [vmem:[#allocation9 + $0xe8] sm:$0xff] %v1684_v14  ;;  %v1621_v27 = vmul.f32 %v2861_v47, %v1551_v13  ;;  %v1622_v10 = vmul.f32 %v2861_v47, %v1552_v40  ;;  %v1687_v12 = vadd.f32 %v2870_v60, %v1617_v15  ;;  %v1688_v54 = vadd.f32 %v2870_v60, %v1618_v39  ;;  %v1572_v14 = vld [vmem:[#allocation9 + $0x1c8] sm:$0xff] }
 0x216   : > { %v1689_v31 = vadd.f32 %v2870_v60, %v1619_v16  ;;  %v1690_v32 = vadd.f32 %v2870_v60, %v1620_v17  ;;  %1749 = vst [vmem:[#allocation9 + $0xf0] sm:$0xff] %v1685_v23  ;;  %1750 = vst [vmem:[#allocation9 + $0xf8] sm:$0xff] %v1686_v25  ;;  %v1623_v41 = vmul.f32 %v2861_v47, %v1553_v18  ;;  %v1575_v18 = vld [vmem:[#allocation9 + $0x1e0] sm:$0xff] }
 0x217   : > { %v1691_v35 = vadd.f32 %v2870_v60, %v1621_v27  ;;  %v1692_v37 = vadd.f32 %v2870_v60, %v1622_v10  ;;  %v1624_v42 = vmul.f32 %v2861_v47, %v1554_v21  ;;  %1751 = vst [vmem:[#allocation9 + $0x100] sm:$0xff] %v1687_v12  ;;  %1752 = vst [vmem:[#allocation9 + $0x108] sm:$0xff] %v1688_v54  ;;  %v1576_v21 = vld [vmem:[#allocation9 + $0x1e8] sm:$0xff]  ;;  %v1577_v12 = vld [vmem:[#allocation9 + $0x1f0] sm:$0xff] }
 0x218   : > { %1753 = vst [vmem:[#allocation9 + $0x110] sm:$0xff] %v1689_v31  ;;  %1754 = vst [vmem:[#allocation9 + $0x118] sm:$0xff] %v1690_v32  ;;  %v1625_v43 = vmul.f32 %v2861_v47, %v1555_v53  ;;  %v1626_v44 = vmul.f32 %v2861_v47, %v1556_v29  ;;  %v1627_v46 = vmul.f32 %v2861_v47, %v1557_v52  ;;  %v1578_v54 = vld [vmem:[#allocation9 + $0x1f8] sm:$0xff] }
 0x219   : > { %v1628_v4 = vmul.f32 %v2861_v47, %v1558_v28  ;;  %1755 = vst [vmem:[#allocation9 + $0x120] sm:$0xff] %v1691_v35  ;;  %1756 = vst [vmem:[#allocation9 + $0x128] sm:$0xff] %v1692_v37  ;;  %v1693_v49 = vadd.f32 %v2870_v60, %v1623_v41  ;;  %v1694_v30 = vadd.f32 %v2870_v60, %v1624_v42 }
 0x21a   : > { %v1629_v24 = vmul.f32 %v2861_v47, %v1559_v33  ;;  %v1630_v51 = vmul.f32 %v2861_v47, %v1560_v34  ;;  %v1695_v58 = vadd.f32 %v2870_v60, %v1625_v43  ;;  %v1696_v61 = vadd.f32 %v2870_v60, %v1626_v44 }
 0x21b   : > { %v1697_v63 = vadd.f32 %v2870_v60, %v1627_v46  ;;  %v1698_v0 = vadd.f32 %v2870_v60, %v1628_v4  ;;  %1757 = vst [vmem:[#allocation9 + $0x130] sm:$0xff] %v1693_v49  ;;  %1758 = vst [vmem:[#allocation9 + $0x138] sm:$0xff] %v1694_v30  ;;  %v1631_v2 = vmul.f32 %v2861_v47, %v1561_v19 }
 0x21c   : > { %v1699_v50 = vadd.f32 %v2870_v60, %v1629_v24  ;;  %v1700_v22 = vadd.f32 %v2870_v60, %v1630_v51  ;;  %v1632_v57 = vmul.f32 %v2861_v47, %v1562_v6  ;;  %1759 = vst [vmem:[#allocation9 + $0x140] sm:$0xff] %v1695_v58  ;;  %1760 = vst [vmem:[#allocation9 + $0x148] sm:$0xff] %v1696_v61 }
 0x21d   : > { %1761 = vst [vmem:[#allocation9 + $0x150] sm:$0xff] %v1697_v63  ;;  %1762 = vst [vmem:[#allocation9 + $0x158] sm:$0xff] %v1698_v0  ;;  %v1633_v3 = vmul.f32 %v2861_v47, %v1563_v48  ;;  %v1634_v5 = vmul.f32 %v2861_v47, %v1564_v26  ;;  %v1635_v7 = vmul.f32 %v2861_v47, %v1565_v55 }
 0x21e   : > { %v1636_v8 = vmul.f32 %v2861_v47, %v1566_v56  ;;  %1763 = vst [vmem:[#allocation9 + $0x160] sm:$0xff] %v1699_v50  ;;  %1764 = vst [vmem:[#allocation9 + $0x168] sm:$0xff] %v1700_v22  ;;  %v1701_v59 = vadd.f32 %v2870_v60, %v1631_v2  ;;  %v1702_v13 = vadd.f32 %v2870_v60, %v1632_v57 }
 0x21f   : > { %v1637_v40 = vmul.f32 %v2861_v47, %v1567_v1  ;;  %v1638_v36 = vmul.f32 %v2861_v47, %v1568_v20  ;;  %v1703_v15 = vadd.f32 %v2870_v60, %v1633_v3  ;;  %v1704_v39 = vadd.f32 %v2870_v60, %v1634_v5 }
 0x220   : > { %v1705_v16 = vadd.f32 %v2870_v60, %v1635_v7  ;;  %v1706_v17 = vadd.f32 %v2870_v60, %v1636_v8  ;;  %1765 = vst [vmem:[#allocation9 + $0x170] sm:$0xff] %v1701_v59  ;;  %1766 = vst [vmem:[#allocation9 + $0x178] sm:$0xff] %v1702_v13  ;;  %v1639_v25 = vmul.f32 %v2861_v47, %v1569_v9 }
 0x221   : > { %v1707_v53 = vadd.f32 %v2870_v60, %v1637_v40  ;;  %v1708_v23 = vadd.f32 %v2870_v60, %v1638_v36  ;;  %v1640_v27 = vmul.f32 %v2861_v47, %v1570_v38  ;;  %1767 = vst [vmem:[#allocation9 + $0x180] sm:$0xff] %v1703_v15  ;;  %1768 = vst [vmem:[#allocation9 + $0x188] sm:$0xff] %v1704_v39 }
 0x222   : > { %1769 = vst [vmem:[#allocation9 + $0x190] sm:$0xff] %v1705_v16  ;;  %1770 = vst [vmem:[#allocation9 + $0x198] sm:$0xff] %v1706_v17  ;;  %v1641_v10 = vmul.f32 %v2861_v47, %v1571_v11  ;;  %v1642_v29 = vmul.f32 %v2861_v47, %v1572_v14  ;;  %v1643_v52 = vmul.f32 %v2861_v47, %v1573_v62 }
 0x223   : > { %v1644_v28 = vmul.f32 %v2861_v47, %v1574_v45  ;;  %1771 = vst [vmem:[#allocation9 + $0x1a0] sm:$0xff] %v1707_v53  ;;  %1772 = vst [vmem:[#allocation9 + $0x1a8] sm:$0xff] %v1708_v23  ;;  %v1709_v31 = vadd.f32 %v2870_v60, %v1639_v25  ;;  %v1710_v32 = vadd.f32 %v2870_v60, %v1640_v27 }
 0x224   : > { %v1645_v33 = vmul.f32 %v2861_v47, %v1575_v18  ;;  %v1646_v34 = vmul.f32 %v2861_v47, %v1576_v21  ;;  %v1711_v35 = vadd.f32 %v2870_v60, %v1641_v10  ;;  %v1712_v37 = vadd.f32 %v2870_v60, %v1642_v29 }
 0x225   : > { %v1713_v41 = vadd.f32 %v2870_v60, %v1643_v52  ;;  %v1714_v42 = vadd.f32 %v2870_v60, %v1644_v28  ;;  %1773 = vst [vmem:[#allocation9 + $0x1b0] sm:$0xff] %v1709_v31  ;;  %1774 = vst [vmem:[#allocation9 + $0x1b8] sm:$0xff] %v1710_v32  ;;  %v1647_v46 = vmul.f32 %v2861_v47, %v1577_v12 }
 0x226   : > { %v1715_v43 = vadd.f32 %v2870_v60, %v1645_v33  ;;  %v1716_v44 = vadd.f32 %v2870_v60, %v1646_v34  ;;  %v1648_v4 = vmul.f32 %v2861_v47, %v1578_v54  ;;  %1775 = vst [vmem:[#allocation9 + $0x1c0] sm:$0xff] %v1711_v35  ;;  %1776 = vst [vmem:[#allocation9 + $0x1c8] sm:$0xff] %v1712_v37 }
 0x227   : > { %1777 = vst [vmem:[#allocation9 + $0x1d0] sm:$0xff] %v1713_v41  ;;  %1778 = vst [vmem:[#allocation9 + $0x1d8] sm:$0xff] %v1714_v42  ;;  %v1717_v19 = vadd.f32 %v2870_v60, %v1647_v46 }
 0x228   : > { %1779 = vst [vmem:[#allocation9 + $0x1e0] sm:$0xff] %v1715_v43  ;;  %1780 = vst [vmem:[#allocation9 + $0x1e8] sm:$0xff] %v1716_v44  ;;  %v1718_v6 = vadd.f32 %v2870_v60, %v1648_v4 }
 0x229   : > { %1781 = vst [vmem:[#allocation9 + $0x1f0] sm:$0xff] %v1717_v19 }
 0x22a   : > { %1782 = vst [vmem:[#allocation9 + $0x1f8] sm:$0xff] %v1718_v6 }
 0x22b PF: > { %p2246_p10 = scmp.eq.s32.totalorder %s2609_s19, 3  ;;  %s2562_s6 = smov [#allocation9]  }
 0x22c   : > { %s1789_s7 = sshll.u32 %s2562_s6, 4  ;;  %s1790_s7 = int_to_ptr.vmem [resolvable:$true] %s1789_s7 }
 0x22d   : > { %s2485_s8 = scalar_lea.vmem %s1790_s7, 8192  ;;  %p2492_p8 = scmp.lt.s32.totalorder %s1790_s7, %s1790_s7 }
 0x22e   : > { %p2486_p1 = scmp.ne.s32.totalorder %s1790_s7, %s2485_s8  ;;  %p2493_p12 = scmp.lt.s32.totalorder %s2485_s8, %s2485_s8 }
 0x230   : > { %p2487_p4 = pnand %p2486_p1, %p2246_p10  ;;  %p2494_p0 = por %p2493_p12, %p2492_p8 }
 0x232   : > { %p2488_p5 = pneg %p2487_p4 }
 0x234   : > { %p2495_p2 = pnand %p2494_p0, %p2488_p5 }
 0x236   : > { %2498 = shalt.err (!%p2495_p2)
}
 0x237   : > { %s2499_s11 = scalar_lea.hbm %s3033_s4, 8192 }
 0x238   : > { %p2500_p11 = scmp.ne.s32.totalorder %s3033_s4, %s2499_s11  ;;  %p2505_p6 = scmp.lt.u32.totalorder %s2499_s11, %s3033_s4 }
 0x23a   : > { %p2501_p13 = pnand %p2500_p11, %p2246_p10 }
 0x23c   : > { %p2502_p3 = pneg %p2501_p13 }
 0x23e   : > { %p2507_p7 = pnand %p2505_p6, %p2502_p3 }
 0x240   : > { %2510 = shalt.err (!%p2507_p7)
}
 0x241   : > { %s2563_s28 = smov 128   ;;  %s2564_s30 = smov 8  }
 0x242   : > { %2232 = dma.vmem_to_hbm [thread:$0]  (%p2246_p10), %s1790_s7, 8192, %s3033_s4, [#allocation6], %s2563_s28, %s2563_s28, %s2564_s30  }
 0x243   : > { %2536 = dma.done.wait (%p2246_p10), [#allocation6], 8192  }
 0x244   : > { %2538 = vsyncadd (%p2246_p10), [#allocation6], 4294959104 }
 0x245 PF: > { %p16_p9 = scmp.ge.s32.totalorder %s2635_s25, 6   ;;  %s3046_s15 = smov %s2545_s16 }
 0x246   : > { %s3047_s16 = smov %s2549_s17  ;;  %s3048_s17 = smov %s2661_s14 }
 0x247   : > { %s3049_s18 = smov %s2635_s25  ;;  %18 = sbr.rel (!%p16_p9) target bundleno = 5 (0x5), region = 86 }
 0x24e   :  { %1805 = vsyncpa [#allocation5], 1 }
 0x24f   :  { %1807 = vsyncpa [#allocation5 + $0x1], 1 }
 0x250   :  { %1808 = vsyncpa [#allocation8], 1 }
 0x251   :  { %1809 = vsyncpa [#allocation6], 1 }
 0x252   :  { %1811 = vsyncpa [#allocation6 + $0x1], 1 }

</bundles_post_ra>
